<compile_context>
chip_gen: v7x
topology: tpu7x:2x2x1
jax: 0.10.0
libtpu: 0.0.40
codegen_flags: <defaults>
</compile_context>

<pallas_src>
import jax
import jax.numpy as jnp
from jax.experimental import pallas as pl
from jax.experimental.pallas import tpu as pltpu


def _round_up(x, m):
    return (x + m - 1) // m * m


def _tpu_kind():
    try:
        return jax.devices()[0].device_kind.lower()
    except Exception:
        return ""


def _make_tap_reader(TH, WO, stride):
    def read_tap(x_ref, row_start, kh, kw):
        # Strided ref reads: no (IN_ROWS, Wp, CINP) halo value is ever live.
        if stride == 1:
            return x_ref[0, pl.ds(row_start + kh, TH), pl.ds(kw, WO), :]
        return x_ref[0, pl.ds(row_start + kh, TH, stride=stride),
                     pl.ds(kw, WO, stride=stride), :]
    return read_tap


def _make_fold_k_kernel(TH, WO, CINP, TN, KH, KW, stride):
    """Small-CIN path: im2col patch built once per (b, row-tile), reused across
    COUT tiles; one MXU matmul with K = KH*KW*CINP per tile."""
    K = KH * KW * CINP
    n_taps = KH * KW
    group = max(1, 128 // CINP)              # taps per lane-dense strip store
    read_tap = _make_tap_reader(TH, WO, stride)

    def kernel(x_ref, w_ref, b_ref, o_ref, patch_ref):
        # x_ref:     (1, Hp, Wp, CINP)  padded image (bf16), resident per batch item
        # w_ref:     (K, TN)            BN-scale-folded weights (bf16)
        # b_ref:     (1, TN)            folded BN bias (f32)
        # o_ref:     (1, TH, WO, TN)    output tile (bf16)
        # patch_ref: (TH*WO, K)         bf16 im2col scratch (persists across j)
        i = pl.program_id(1)
        j = pl.program_id(2)
        row_start = pl.multiple_of(i * (TH * stride), 8)

        @pl.when(j == 0)
        def _build_patch():
            for g0 in range(0, n_taps, group):
                g1 = min(g0 + group, n_taps)
                parts = []
                for t in range(g0, g1):
                    kh, kw = divmod(t, KW)
                    tap = read_tap(x_ref, row_start, kh, kw)      # (TH, WO, CINP)
                    parts.append(tap.reshape(TH * WO, CINP))
                strip = parts[0] if len(parts) == 1 else jnp.concatenate(parts, axis=-1)
                patch_ref[:, g0 * CINP:g1 * CINP] = strip          # one wide store

        acc = jnp.dot(patch_ref[...], w_ref[...],
                      preferred_element_type=jnp.float32)          # (TH*WO, TN) f32
        y = jnp.maximum(acc + b_ref[...], 0.0)                     # BN bias + ReLU
        o_ref[0] = y.reshape(TH, WO, TN).astype(o_ref.dtype)

    return kernel


def _make_per_tap_kernel(TH, WO, CINP, TN, KH, KW, stride):
    """Large-CIN path (CINP >= 128): skip the patch scratch; accumulate KH*KW
    lane-dense matmuls (K = CINP) directly in an f32 accumulator."""
    read_tap = _make_tap_reader(TH, WO, stride)

    def kernel(x_ref, w_ref, b_ref, o_ref):
        i = pl.program_id(1)
        row_start = pl.multiple_of(i * (TH * stride), 8)
        acc = jnp.zeros((TH * WO, TN), jnp.float32)
        for kh in range(KH):
            for kw in range(KW):
                t = kh * KW + kw
                tap = read_tap(x_ref, row_start, kh, kw)           # (TH, WO, CINP)
                acc = acc + jnp.dot(tap.reshape(TH * WO, CINP),
                                    w_ref[t * CINP:(t + 1) * CINP, :],
                                    preferred_element_type=jnp.float32)
        y = jnp.maximum(acc + b_ref[...], 0.0)
        o_ref[0] = y.reshape(TH, WO, TN).astype(o_ref.dtype)

    return kernel


def conv_bn_act(x_nchw, w_oihw, gamma, beta, running_mean, running_var,
                *, stride=1, eps=1e-5):
    """ConvBnAct forward (inference BN). x: (B,Cin,H,W), w: (Cout,Cin,KH,KW)."""
    B, CIN, H, W = x_nchw.shape
    COUT, _, KH, KW = w_oihw.shape
    pad = KH // 2                        # matches nn.Conv2d(..., padding=kernel_size // 2)
    HO = (H + 2 * pad - KH) // stride + 1
    WO = (W + 2 * pad - KW) // stride + 1

    kind = _tpu_kind()
    wide_mxu = ("v6" in kind) or ("v7" in kind)   # 2x256x256 MXU on v6e / v7x
    is_v7 = "v7" in kind

    # ---- tiling choices -----------------------------------------------------
    TN = 256 if (wide_mxu and COUT > 128) else 128
    COUTP = _round_up(COUT, TN)
    CINP = _round_up(CIN, 8)
    m_target = 256 if wide_mxu else 128           # target MXU M dim per matmul
    TH = _round_up(max(1, -(-m_target // max(WO, 1))), 8)
    TH = min(TH, _round_up(HO, 8))                # don't over-pad tiny images
    HOP = _round_up(HO, TH)

    K = KH * KW * CINP
    use_fold_k = CINP < 128
    rows_touched = (HOP - 1) * stride + KH        # padded rows the kernel may read

    # ---- glue (plain JAX): layout, padding, BN folding ----------------------
    x_nhwc = jnp.transpose(x_nchw, (0, 2, 3, 1))  # pad in input dtype, cast once
    Hp = max(H + 2 * pad, rows_touched)
    Wp = W + 2 * pad
    x_pad = jnp.pad(
        x_nhwc,
        ((0, 0), (pad, Hp - H - pad), (pad, pad), (0, CINP - CIN)),
    ).astype(jnp.bfloat16)                                        # (B, Hp, Wp, CINP)

    scale = gamma.astype(jnp.float32) * jax.lax.rsqrt(
        running_var.astype(jnp.float32) + eps)
    bias = beta.astype(jnp.float32) - running_mean.astype(jnp.float32) * scale

    w_hwio = jnp.transpose(w_oihw, (2, 3, 1, 0)).astype(jnp.float32)  # (KH,KW,CIN,COUT)
    w_hwio = w_hwio * scale[None, None, None, :]                      # fold BN scale
    w_hwio = jnp.pad(w_hwio, ((0, 0), (0, 0), (0, CINP - CIN), (0, COUTP - COUT)))
    w_mat = w_hwio.reshape(K, COUTP).astype(jnp.bfloat16)
    bias_p = jnp.pad(bias, (0, COUTP - COUT)).reshape(1, COUTP)

    # ---- explicit VMEM budget (double-buffered in/out + scratch) -------------
    img_b = Hp * Wp * CINP * 2
    w_b = K * TN * 2
    bias_b = TN * 4
    out_b = TH * WO * TN * 2                      # bf16 output tile
    patch_b = TH * WO * K * 2 if use_fold_k else 0
    needed = 2 * (img_b + w_b + bias_b + out_b) + patch_b
    cap = (48 if is_v7 else 100) * 1024 * 1024    # v7x has 64 MiB VMEM / TC
    vmem_limit = int(min(cap, max(needed + (8 << 20), 32 << 20)))

    if use_fold_k:
        kernel = _make_fold_k_kernel(TH, WO, CINP, TN, KH, KW, stride)
        scratch = [pltpu.VMEM((TH * WO, K), jnp.bfloat16)]
    else:
        kernel = _make_per_tap_kernel(TH, WO, CINP, TN, KH, KW, stride)
        scratch = []

    out_nhwc = pl.pallas_call(
        kernel,
        out_shape=jax.ShapeDtypeStruct((B, HOP, WO, COUTP), jnp.bfloat16),
        grid_spec=pltpu.PrefetchScalarGridSpec(
            num_scalar_prefetch=0,
            grid=(B, HOP // TH, COUTP // TN),
            in_specs=[
                pl.BlockSpec((1, Hp, Wp, CINP), lambda b, i, j: (b, 0, 0, 0)),
                pl.BlockSpec((K, TN), lambda b, i, j: (0, j)),
                pl.BlockSpec((1, TN), lambda b, i, j: (0, j)),
            ],
            out_specs=pl.BlockSpec((1, TH, WO, TN), lambda b, i, j: (b, i, 0, j)),
            scratch_shapes=scratch,
        ),
        compiler_params=pltpu.CompilerParams(
            # j MUST be "arbitrary": the im2col patch is built only at j == 0
            # and reused by later j steps (the scratch persists across j).
            dimension_semantics=("parallel", "parallel", "arbitrary"),
            vmem_limit_bytes=vmem_limit,
        ),
    )(x_pad, w_mat, bias_p)

    out = out_nhwc[:, :HO, :, :COUT]              # drop row/channel padding
    return jnp.transpose(out, (0, 3, 1, 2)).astype(x_nchw.dtype)   # back to NCHW


def _reference(x_nchw, w_oihw, gamma, beta, running_mean, running_var,
               *, stride=1, eps=1e-5):
    pad = w_oihw.shape[2] // 2
    y = jax.lax.conv_general_dilated(
        x_nchw.astype(jnp.float32), w_oihw.astype(jnp.float32),
        window_strides=(stride, stride),
        padding=[(pad, pad), (pad, pad)],
        dimension_numbers=("NCHW", "OIHW", "NCHW"))
    scale = gamma / jnp.sqrt(running_var + eps)
    bias = beta - running_mean * scale
    y = y * scale[None, :, None, None] + bias[None, :, None, None]
    return jnp.maximum(y, 0.0)


if __name__ == "__main__":
    key = jax.random.PRNGKey(0)
    B, CIN, H, W = 2, 4, 16, 16
    COUT, K, STRIDE = 8, 3, 1

    k_x, k_w, k_g, k_b, k_m, k_v = jax.random.split(key, 6)
    x = jax.random.normal(k_x, (B, CIN, H, W), dtype=jnp.float32)
    # deterministic parameter init (shapes per nn.Conv2d / nn.BatchNorm2d)
    w = jax.random.normal(k_w, (COUT, CIN, K, K), dtype=jnp.float32) * 0.1
    gamma = 1.0 + 0.1 * jax.random.normal(k_g, (COUT,), dtype=jnp.float32)
    beta = 0.1 * jax.random.normal(k_b, (COUT,), dtype=jnp.float32)
    running_mean = 0.1 * jax.random.normal(k_m, (COUT,), dtype=jnp.float32)
    running_var = jnp.abs(1.0 + 0.1 * jax.random.normal(k_v, (COUT,), dtype=jnp.float32))

    out = conv_bn_act(x, w, gamma, beta, running_mean, running_var, stride=STRIDE)
    out = jax.block_until_ready(out)

    ref = _reference(x, w, gamma, beta, running_mean, running_var, stride=STRIDE)
    assert out.shape == ref.shape == (B, COUT, H // STRIDE, W // STRIDE)
    # bf16 operands + bf16 output (f32 accumulation) -> loosened tolerance
    assert jnp.allclose(out, ref, atol=5e-2, rtol=5e-2), "mismatch vs JAX reference"

    print("KERNEL_OK")
</pallas_src>

<mosaic_0001>
module attributes {stable_mosaic.version = 11 : i64} {
  func.func @kernel(%arg0: i32, %arg1: i32, %arg2: i32, %arg3: memref<1x18x18x8xbf16, #tpu.memory_space<vmem>>, %arg4: memref<72x128xbf16, #tpu.memory_space<vmem>>, %arg5: memref<1x128xf32, #tpu.memory_space<vmem>>, %arg6: memref<1x8x16x128xbf16, #tpu.memory_space<vmem>>, %arg7: memref<128x72xbf16, #tpu.memory_space<vmem>>) attributes {dimension_semantics = [#tpu.dimension_semantics<parallel>, #tpu.dimension_semantics<parallel>, #tpu.dimension_semantics<arbitrary>], iteration_bounds = array<i64: 2, 2, 1>, scalar_prefetch = 0 : i64, scratch_operands = 1 : i64, tpu.core_type = #tpu.core_type<tc>, window_params = [{transform_indices = @transform_0, window_bounds = array<i64: 1, 18, 18, 8>}, {transform_indices = @transform_1, window_bounds = array<i64: 72, 128>}, {transform_indices = @transform_2, window_bounds = array<i64: 1, 128>}, {transform_indices = @transform_3, window_bounds = array<i64: 1, 8, 16, 128>}]} {
    %c8_i32 = arith.constant 8 : i32
    %0 = arith.muli %arg1, %c8_i32 : i32
    %1 = tpu.assume_multiple %0, 8 : i32
    %c0_i32 = arith.constant 0 : i32
    %2 = arith.cmpi eq, %arg2, %c0_i32 : i32
    %3 = arith.extui %2 : i1 to i32
    %c0_i32_0 = arith.constant 0 : i32
    %4 = arith.cmpi ne, %3, %c0_i32_0 : i32
    scf.if %4 {
      %c0_i32_11 = arith.constant 0 : i32
      %18 = arith.addi %1, %c0_i32_11 : i32
      %c0_12 = arith.constant 0 : index
      %19 = arith.index_cast %18 : i32 to index
      %c0_13 = arith.constant 0 : index
      %c0_14 = arith.constant 0 : index
      %20 = vector.load %arg3[%c0_12, %19, %c0_13, %c0_14] : memref<1x18x18x8xbf16, #tpu.memory_space<vmem>>, vector<1x8x16x8xbf16>
      %21 = vector.shape_cast %20 : vector<1x8x16x8xbf16> to vector<8x16x8xbf16>
      %22 = vector.shape_cast %21 : vector<8x16x8xbf16> to vector<128x8xbf16>
      %c0_i32_15 = arith.constant 0 : i32
      %23 = arith.addi %1, %c0_i32_15 : i32
      %c0_16 = arith.constant 0 : index
      %24 = arith.index_cast %23 : i32 to index
      %c1 = arith.constant 1 : index
      %c0_17 = arith.constant 0 : index
      %25 = vector.load %arg3[%c0_16, %24, %c1, %c0_17] : memref<1x18x18x8xbf16, #tpu.memory_space<vmem>>, vector<1x8x16x8xbf16>
      %26 = vector.shape_cast %25 : vector<1x8x16x8xbf16> to vector<8x16x8xbf16>
      %27 = vector.shape_cast %26 : vector<8x16x8xbf16> to vector<128x8xbf16>
      %c0_i32_18 = arith.constant 0 : i32
      %28 = arith.addi %1, %c0_i32_18 : i32
      %c0_19 = arith.constant 0 : index
      %29 = arith.index_cast %28 : i32 to index
      %c2 = arith.constant 2 : index
      %c0_20 = arith.constant 0 : index
      %30 = vector.load %arg3[%c0_19, %29, %c2, %c0_20] : memref<1x18x18x8xbf16, #tpu.memory_space<vmem>>, vector<1x8x16x8xbf16>
      %31 = vector.shape_cast %30 : vector<1x8x16x8xbf16> to vector<8x16x8xbf16>
      %32 = vector.shape_cast %31 : vector<8x16x8xbf16> to vector<128x8xbf16>
      %c1_i32 = arith.constant 1 : i32
      %33 = arith.addi %1, %c1_i32 : i32
      %c0_21 = arith.constant 0 : index
      %34 = arith.index_cast %33 : i32 to index
      %c0_22 = arith.constant 0 : index
      %c0_23 = arith.constant 0 : index
      %35 = vector.load %arg3[%c0_21, %34, %c0_22, %c0_23] : memref<1x18x18x8xbf16, #tpu.memory_space<vmem>>, vector<1x8x16x8xbf16>
      %36 = vector.shape_cast %35 : vector<1x8x16x8xbf16> to vector<8x16x8xbf16>
      %37 = vector.shape_cast %36 : vector<8x16x8xbf16> to vector<128x8xbf16>
      %c1_i32_24 = arith.constant 1 : i32
      %38 = arith.addi %1, %c1_i32_24 : i32
      %c0_25 = arith.constant 0 : index
      %39 = arith.index_cast %38 : i32 to index
      %c1_26 = arith.constant 1 : index
      %c0_27 = arith.constant 0 : index
      %40 = vector.load %arg3[%c0_25, %39, %c1_26, %c0_27] : memref<1x18x18x8xbf16, #tpu.memory_space<vmem>>, vector<1x8x16x8xbf16>
      %41 = vector.shape_cast %40 : vector<1x8x16x8xbf16> to vector<8x16x8xbf16>
      %42 = vector.shape_cast %41 : vector<8x16x8xbf16> to vector<128x8xbf16>
      %c1_i32_28 = arith.constant 1 : i32
      %43 = arith.addi %1, %c1_i32_28 : i32
      %c0_29 = arith.constant 0 : index
      %44 = arith.index_cast %43 : i32 to index
      %c2_30 = arith.constant 2 : index
      %c0_31 = arith.constant 0 : index
      %45 = vector.load %arg3[%c0_29, %44, %c2_30, %c0_31] : memref<1x18x18x8xbf16, #tpu.memory_space<vmem>>, vector<1x8x16x8xbf16>
      %46 = vector.shape_cast %45 : vector<1x8x16x8xbf16> to vector<8x16x8xbf16>
      %47 = vector.shape_cast %46 : vector<8x16x8xbf16> to vector<128x8xbf16>
      %c2_i32 = arith.constant 2 : i32
      %48 = arith.addi %1, %c2_i32 : i32
      %c0_32 = arith.constant 0 : index
      %49 = arith.index_cast %48 : i32 to index
      %c0_33 = arith.constant 0 : index
      %c0_34 = arith.constant 0 : index
      %50 = vector.load %arg3[%c0_32, %49, %c0_33, %c0_34] : memref<1x18x18x8xbf16, #tpu.memory_space<vmem>>, vector<1x8x16x8xbf16>
      %51 = vector.shape_cast %50 : vector<1x8x16x8xbf16> to vector<8x16x8xbf16>
      %52 = vector.shape_cast %51 : vector<8x16x8xbf16> to vector<128x8xbf16>
      %c2_i32_35 = arith.constant 2 : i32
      %53 = arith.addi %1, %c2_i32_35 : i32
      %c0_36 = arith.constant 0 : index
      %54 = arith.index_cast %53 : i32 to index
      %c1_37 = arith.constant 1 : index
      %c0_38 = arith.constant 0 : index
      %55 = vector.load %arg3[%c0_36, %54, %c1_37, %c0_38] : memref<1x18x18x8xbf16, #tpu.memory_space<vmem>>, vector<1x8x16x8xbf16>
      %56 = vector.shape_cast %55 : vector<1x8x16x8xbf16> to vector<8x16x8xbf16>
      %57 = vector.shape_cast %56 : vector<8x16x8xbf16> to vector<128x8xbf16>
      %c2_i32_39 = arith.constant 2 : i32
      %58 = arith.addi %1, %c2_i32_39 : i32
      %c0_40 = arith.constant 0 : index
      %59 = arith.index_cast %58 : i32 to index
      %c2_41 = arith.constant 2 : index
      %c0_42 = arith.constant 0 : index
      %60 = vector.load %arg3[%c0_40, %59, %c2_41, %c0_42] : memref<1x18x18x8xbf16, #tpu.memory_space<vmem>>, vector<1x8x16x8xbf16>
      %61 = vector.shape_cast %60 : vector<1x8x16x8xbf16> to vector<8x16x8xbf16>
      %62 = vector.shape_cast %61 : vector<8x16x8xbf16> to vector<128x8xbf16>
      %63 = tpu.concatenate %22, %27, %32, %37, %42, %47, %52, %57, %62 in 1 : vector<128x8xbf16>, vector<128x8xbf16>, vector<128x8xbf16>, vector<128x8xbf16>, vector<128x8xbf16>, vector<128x8xbf16>, vector<128x8xbf16>, vector<128x8xbf16>, vector<128x8xbf16> -> vector<128x72xbf16>
      %c0_43 = arith.constant 0 : index
      %c0_44 = arith.constant 0 : index
      %64 = vector.load %arg7[%c0_43, %c0_44] : memref<128x72xbf16, #tpu.memory_space<vmem>>, vector<128x72xbf16>
      tpu.vector_store %arg7[%c0_43, %c0_44], %63 {strides = array<i32>} : memref<128x72xbf16, #tpu.memory_space<vmem>>, vector<128x72xbf16>,
    } else {
    }
    %c0 = arith.constant 0 : index
    %c0_1 = arith.constant 0 : index
    %5 = vector.load %arg7[%c0, %c0_1] : memref<128x72xbf16, #tpu.memory_space<vmem>>, vector<128x72xbf16>
    %c0_2 = arith.constant 0 : index
    %c0_3 = arith.constant 0 : index
    %6 = vector.load %arg4[%c0_2, %c0_3] : memref<72x128xbf16, #tpu.memory_space<vmem>>, vector<72x128xbf16>
    %cst = arith.constant dense<0.000000e+00> : vector<128x128xf32>
    %7 = tpu.matmul %5, %6, %cst {dimension_numbers = #tpu.dot_dimension_numbers<[1], [0], [0], [1], [0, 0, 1, 1], [], []>} : vector<128x72xbf16>, vector<72x128xbf16>, vector<128x128xf32> -> vector<128x128xf32>
    %c0_4 = arith.constant 0 : index
    %c0_5 = arith.constant 0 : index
    %8 = vector.load %arg5[%c0_4, %c0_5] : memref<1x128xf32, #tpu.memory_space<vmem>>, vector<1x128xf32>
    %9 = vector.broadcast %8 : vector<1x128xf32> to vector<128x128xf32>
    %10 = arith.addf %7, %9 : vector<128x128xf32>
    %cst_6 = arith.constant 0.000000e+00 : f32
    %11 = vector.broadcast %cst_6 : f32 to vector<128x128xf32>
    %12 = arith.maximumf %10, %11 : vector<128x128xf32>
    %13 = vector.shape_cast %12 : vector<128x128xf32> to vector<8x16x128xf32>
    %14 = arith.truncf %13 : vector<8x16x128xf32> to vector<8x16x128xbf16>
    %c0_7 = arith.constant 0 : index
    %c0_8 = arith.constant 0 : index
    %c0_9 = arith.constant 0 : index
    %c0_10 = arith.constant 0 : index
    %15 = vector.load %arg6[%c0_7, %c0_8, %c0_9, %c0_10] : memref<1x8x16x128xbf16, #tpu.memory_space<vmem>>, vector<1x8x16x128xbf16>
    %16 = vector.shape_cast %15 : vector<1x8x16x128xbf16> to vector<8x16x128xbf16>
    %17 = vector.shape_cast %14 : vector<8x16x128xbf16> to vector<1x8x16x128xbf16>
    tpu.vector_store %arg6[%c0_7, %c0_8, %c0_9, %c0_10], %17 {strides = array<i32>} : memref<1x8x16x128xbf16, #tpu.memory_space<vmem>>, vector<1x8x16x128xbf16>,
    return
  }
  func.func @transform_0(%arg0: i32, %arg1: i32, %arg2: i32) -> (i32, i32, i32, i32) {
    %c0_i32 = arith.constant 0 : i32
    %c0_i32_0 = arith.constant 0 : i32
    %c0_i32_1 = arith.constant 0 : i32
    %c0_i32_2 = arith.constant 0 : i32
    return %arg0, %c0_i32, %c0_i32_0, %c0_i32_1 : i32, i32, i32, i32
  }
  func.func @transform_1(%arg0: i32, %arg1: i32, %arg2: i32) -> (i32, i32) {
    %c0_i32 = arith.constant 0 : i32
    %c0_i32_0 = arith.constant 0 : i32
    return %c0_i32, %arg2 : i32, i32
  }
  func.func @transform_2(%arg0: i32, %arg1: i32, %arg2: i32) -> (i32, i32) {
    %c0_i32 = arith.constant 0 : i32
    %c0_i32_0 = arith.constant 0 : i32
    return %c0_i32, %arg2 : i32, i32
  }
  func.func @transform_3(%arg0: i32, %arg1: i32, %arg2: i32) -> (i32, i32, i32, i32) {
    %c0_i32 = arith.constant 0 : i32
    %c0_i32_0 = arith.constant 0 : i32
    return %arg0, %arg1, %c0_i32, %arg2 : i32, i32, i32, i32
  }
}

</mosaic_0001>

<bundles_post_ra>
// kernel: tpu_custom_call.1
= control target key start
LH: loop header
LB: loop body
LE: loop exit
PB: predicated region body
PF: predicated region fallthrough
CT: control target
= control target key end

     0   :  { %8 = vsyncpa [#allocation4], 0  ;;  %s3665_s0 = inlined_call_operand.vmem [shape: bf16[2,18,18,8], index: 0, kind: input, shape index: {}]   ;;  %s3666_s1 = inlined_call_operand.vmem [shape: bf16[72,128], index: 1, kind: input, shape index: {}]   ;;  %s3667_s2 = inlined_call_operand.vmem [shape: f32[1,128], index: 2, kind: input, shape index: {}]   ;;  %s3668_s3 = inlined_call_operand.hbm [shape: bf16[2,16,16,128], index: 3, kind: output, shape index: {}]  }
   0x1   :  { %10 = vsyncpa [#allocation4 + $0x1], 0  ;;  %s2669_s12 = smov 0   ;;  %s2671_s13 = smov 0  }
   0x2   :  { %s2673_s14 = smov 0   ;;  %s2675_s15 = smov 0  }
   0x3   :  { %s2677_s16 = smov 0   ;;  %s2679_s17 = smov 0  }
   0x4   :  { %s2681_s18 = smov 0   ;;  %s2683_s19 = smov 0  }
   0x5 LB: > { %s2096_s20 = sadd.s32 4294967295, %s2637_s19   ;;  %s2097_s21 = sadd.s32 4294967294, %s2637_s19   ;;  %s2637_s19 = sphi %s2683_s19, %s16_s19   ;;  %s2633_s18 = sphi %s2681_s18, %s3681_s18   ;;  %s2629_s17 = sphi %s2679_s17, %s3680_s17   ;;  %s2625_s16 = sphi %s2677_s16, %s3679_s16   ;;  %s2621_s15 = sphi %s2675_s15, %s3678_s15   ;;  %s2617_s14 = sphi %s2673_s14, %s3677_s14   ;;  %s2613_s13 = sphi %s2671_s13, %s3676_s13   ;;  %s2609_s12 = sphi %s2669_s12, %s3675_s12  }
   0x6   : > { %s31_s22 = sadd.s32 1, %s2629_s17  ;;  %s35_s23 = sadd.s32 1, %s2633_s18 }
   0x7   : > { %p33_p0 = scmp.ge.s32.totalorder %s31_s22, 2  ;;  %p134_p1 = scmp.ne.s32.totalorder %s2617_s14, %s2613_s13 }
   0x8   : > { %p135_p2 = scmp.eq.s32.totalorder %s2096_s20, 3  ;;  %p140_p5 = scmp.ne.s32.totalorder %s2613_s13, %s2609_s12 }
   0x9   : > { %s3683_s22 = smov (%p33_p0, %s31_s22), 0  ;;  %s3685_s23 = smov (!%p33_p0, %s35_s23), %s2633_s18 }
   0xa   : > { %s118_s24 = ssub.s32 %s2629_s17, %s3683_s22  ;;  %p2720_p3 = por %p135_p2, %p134_p1 }
   0xb   : > { %p37_p4 = scmp.ge.s32.totalorder %s3685_s23, 2  ;;  %p141_p6 = scmp.eq.s32.totalorder %s2097_s21, 3 }
   0xc   : > { %p2102_p7 = scmp.ge.s32.totalorder %s2637_s19, 1  ;;  %p180_p9 = scmp.lt.s32.totalorder %s2637_s19, 5 }
   0xd   : > { %s3687_s23 = smov (%p37_p4, %s3685_s23), 0  ;;  %p2729_p8 = por %p141_p6, %p140_p5 }
   0xe   : > { %s117_s27 = ssub.s32 %s2633_s18, %s3687_s23  ;;  %s124_s28 = sadd.s32 1, %s2617_s14 }
   0xf   : > { %s119_s29 = sor.u32 %s118_s24, %s117_s27  ;;  %p181_p10 = pnand %p2102_p7, %p180_p9 }
  0x10   : > { %p122_p11 = scmp.eq.s32.totalorder %s119_s29, 0  ;;  %p211_p12 = scmp.lt.s32.totalorder (!%p181_p10), %s2625_s16, 1  ;;  %vm484_vm0 = vcmask (!%p181_p10), 1042432   ;;  %vm485_vm1 = vcmask (!%p181_p10), 1046532   ;;  %vm257_vm3 = vsmask.f32 (!%p181_p10), 3328 }
  0x11   : > { %184 = sbr.rel (%p181_p10) target bundleno = 545 (0x221), region = 32  ;;  %s2639_s11 = smov (!%p181_p10), 24   ;;  %vm2794_vm2 = vmor (!%p181_p10), %vm484_vm0, %vm485_vm1  ;;  %vm258_vm4 = vsmask.f32 (!%p181_p10), 7440  ;;  %vm1764_vm6 = vcmask (!%p181_p10), 1043456   ;;  %vm1527_vm7 = vcmask (!%p181_p10), 64512  }
  0x12   : > { %s2738_s30 = scalar_select %p122_p11, %s2617_s14, %s124_s28  }
  0x13   : > { %s2309_s5 = smul.u32 (!%p181_p10), 96, %s2621_s15  ;;  %s2640_s20 = smov (!%p181_p10), 16   ;;  %vm2860_vm5 = vmor (!%p181_p10), %vm257_vm3, %vm258_vm4  ;;  %vm1552_vm8 = vcmask (!%p181_p10), 130048   ;;  %vm1569_vm9 = vcmask (!%p181_p10), 195584   ;;  %vm1586_vm10 = vcmask (!%p181_p10), 261120   ;;  %vm1603_vm11 = vcmask (!%p181_p10), 326656  }
  0x14   : > { %s2641_s21 = smov (!%p181_p10), 8   ;;  %s2642_s24 = smov (!%p181_p10), 32   ;;  %vm1620_vm12 = vcmask (!%p181_p10), 392192   ;;  %vm1637_vm13 = vcmask (!%p181_p10), 457728   ;;  %vm1654_vm14 = vcmask (!%p181_p10), 523264   ;;  %vm1679_vm15 = vcmask (!%p181_p10), 588800  }
  0x15   : > { %s2643_s27 = smov (!%p181_p10), 40   ;;  %s2644_s28 = smov (!%p181_p10), 48  }
  0x16   : > { %s2645_s7 = smov (!%p181_p10), 56   ;;  %s2646_s29 = smov (!%p181_p10), 64  }
  0x18   : > { %s212_s4 = scalar_select %p211_p12, %s2625_s16, 1 }
  0x1a   : > { %s2425_s6 = smul.u32 216, %s212_s4 }
  0x1c   : > { %s215_s9 = scalar_lea.vmem %s3665_s0, %s2425_s6  ;;  %s2326_s6 = sshll.u32 %s2621_s15, 4 }
  0x1d   : > { %s2746_s10 = scalar_lea.vmem %s215_s9, %s2309_s5 }
  0x1e   : > { %v2126_v0 = vld [vmem:[%s2746_s10 + $0x3c] sm:$0xf]  ;;  %v2750_v1 = vld [vmem:[%s2746_s10 + $0x40] sm:$0xf]  ;;  %v2118_v2 = vld [vmem:[%s2746_s10 + $0xc] sm:$0xf] }
  0x1f   : > { %v677_v3 = vshll.u32 %v2750_v1, 16  ;;  %v681_v4 = vshrl.u32 %v2750_v1, 16  ;;  %v2228_v5 = vcombine.low %v2126_v0, %v2750_v1  ;;  %v668_v6 = vshrl.u32 %v2126_v0, 16  ;;  %v2757_v7 = vld [vmem:[%s2746_s10 + $0x10] sm:$0xf] }
  0x20   : > { %v671_v8 = vshll.u32 %v2126_v0, 16  ;;  %v581_v9 = vshll.u32 %v2757_v7, 16  ;;  %v585_v10 = vshrl.u32 %v2757_v7, 16  ;;  %v2224_v11 = vcombine.low %v2118_v2, %v2757_v7  ;;  %v2128_v12 = vld [vmem:[%s2746_s10 + $0x48] sm:$0xf] }
  0x21   : > { %v2763_v13 = vrot.slane %v681_v4, 4  ;;  %1311 = vrot.lane.b32.xlu1 %v2228_v5, %s2639_s11  ;;  %v670_v14 = vrot.slane %v668_v6, 4  ;;  %v572_v15 = vshrl.u32 %v2118_v2, 16  ;;  %v575_v16 = vshll.u32 %v2118_v2, 16  ;;  %v2767_v17 = vld [vmem:[%s2746_s10 + $0x4c] sm:$0xf] }
  0x22   : > { %v673_v18 = vrot.slane %v671_v8, 5  ;;  %v2769_v19 = vrot.slane %v585_v10, 4  ;;  %1303 = vrot.lane.b32.xlu0 %v2224_v11, %s2639_s11  ;;  %v692_v20 = vshrl.u32 %v2128_v12, 16  ;;  %v695_v21 = vshll.u32 %v2128_v12, 16  ;;  %v2120_v22 = vld [vmem:[%s2746_s10 + $0x18] sm:$0xf] }
  0x23   : > { %v574_v23 = vrot.slane %v572_v15, 4  ;;  %v577_v24 = vrot.slane %v575_v16, 5  ;;  %v705_v25 = vshrl.u32 %v2767_v17, 16  ;;  %v2229_v26 = vcombine.low %v2128_v12, %v2767_v17  ;;  %v2776_v27 = vld [vmem:[%s2746_s10 + $0x1c] sm:$0xf] }
  0x24   : > { %v674_v28 = vor.u32 %v673_v18, %v670_v14  ;;  %v2778_v29 = vrot.slane %v692_v20, 4  ;;  %v2780_v30 = vrot.slane %v695_v21, 5  ;;  %v596_v31 = vshrl.u32 %v2120_v22, 16  ;;  %v2783_v32 = vld [vmem:[%s2746_s10 + $0x34] sm:$0xf] }
  0x25   : > { %v578_v33 = vor.u32 %v577_v24, %v574_v23  ;;  %1313 = vrot.lane.b32.xlu1 %v2229_v26, %s2639_s11  ;;  %v599_v34 = vshll.u32 %v2120_v22, 16  ;;  %v609_v35 = vshrl.u32 %v2776_v27, 16  ;;  %v2225_v36 = vcombine.low %v2120_v22, %v2776_v27  ;;  %v2789_v37 = vld [vmem:[%s2746_s10 + $0x38] sm:$0x1]  ;;  %v456_v38 = vld [vmem:[%s2746_s10 + $0x30] sm:$0xe] }
  0x26   : > { %v2798_v40 = vrot.slane %v674_v28, 4  ;;  %v2800_v41 = vrot.slane %v596_v31, 4  ;;  %v2112_v42 = vrot.slane %v456_v38, 9  ;;  %v517_v43 = vrot.slane %v2783_v32, 5  ;;  %v2804_v44 = vld [vmem:[%s2746_s10 + $0x4] sm:$0xf] }
  0x27   : > { %v2806_v45 = vrot.slane %v578_v33, 4  ;;  %v2808_v46 = vrot.slane %v599_v34, 5  ;;  %1305 = vrot.lane.b32.xlu0 %v2225_v36, %s2639_s11  ;;  %v520_v47 = vrot.slane %v2789_v37, 5  ;;  %v2813_v48 = vld [vmem:[%s2746_s10 + $0x8] sm:$0x1]  ;;  %v489_v49 = vrot.slane %v2804_v44, 5 }
  0x28   : > { %v518_v50 = vsel %vm2794_vm2, %v2112_v42, %v517_v43  ;;  %v519_v51 = vrot.slane %v517_v43, 4  ;;  %v452_v52 = vld [vmem:[%s2746_s10] sm:$0xe]  ;;  %v492_v53 = vrot.slane %v2813_v48, 5  ;;  %v2824_v57 = vld [vmem:[%s2746_s10 + $0x44] sm:$0x1]  ;;  %v698_v59 = vor.u32 %v2780_v30, %v2778_v29 }
  0x29   : > { %v2821_v54 = vld [vmem:[%s2746_s10 + $0x40] sm:$0xf]  ;;  %v2108_v55 = vrot.slane %v452_v52, 9  ;;  %v491_v56 = vrot.slane %v489_v49, 4  ;;  %v457_v58 = vld [vmem:[%s2746_s10 + $0x3c] sm:$0xe]  ;;  %v602_v60 = vor.u32 %v2808_v46, %v2800_v41 }
  0x2a   : > { %v521_v61 = vsel %vm2794_vm2, %v519_v51, %v520_v47  ;;  %v2113_v62 = vrot.slane %v457_v58, 9  ;;  %v524_v63 = vrot.slane %v2821_v54, 5  ;;  %v527_v0 = vrot.slane %v2824_v57, 5  ;;  %v236_v2 = vld [vmem:[%s2746_s10 + $0x10] sm:$0xf] }
  0x2b   : > { %v2220_v4 = vcombine.low %v518_v50, %v521_v61  ;;  %v490_v5 = vsel %vm2794_vm2, %v2108_v55, %v489_v49  ;;  %v493_v6 = vsel %vm2794_vm2, %v491_v56, %v492_v53  ;;  %v250_v8 = vld [vmem:[%s2746_s10 + $0x14] sm:$0x1]  ;;  %v453_v10 = vld [vmem:[%s2746_s10 + $0xc] sm:$0xe]  ;;  %v496_v11 = vrot.slane %v236_v2, 5 }
  0x2c   : > { %v2216_v12 = vcombine.low %v490_v5, %v493_v6  ;;  %v525_v14 = vsel %vm2794_vm2, %v2113_v62, %v524_v63  ;;  %v526_v15 = vrot.slane %v524_v63, 4  ;;  %v2109_v16 = vrot.slane %v453_v10, 9  ;;  %v235_v18 = vld [vmem:[%s2746_s10 + $0xc] sm:$0xf]  ;;  %v233_v33 = vld [vmem:[%s2746_s10] sm:$0xf] }
  0x2d   : > { %1263 = vrot.lane.b32.xlu1 %v2220_v4, %s2640_s20  ;;  %v498_v20 = vrot.slane %v496_v11, 4  ;;  %v499_v21 = vrot.slane %v250_v8, 5  ;;  %v285_v22 = vshrl.u32 %v235_v18, 16  ;;  %v288_v23 = vshll.u32 %v235_v18, 16  ;;  %v243_v56 = vld [vmem:[%s2746_s10 + $0x3c] sm:$0xf] }
  0x2e   : > { %1255 = vrot.lane.b32.xlu0 %v2216_v12, %s2640_s20  ;;  %v528_v24 = vsel %vm2794_vm2, %v526_v15, %v527_v0  ;;  %v497_v26 = vsel %vm2794_vm2, %v2109_v16, %v496_v11  ;;  %v294_v28 = vshll.u32 %v236_v2, 16  ;;  %v298_v31 = vshrl.u32 %v236_v2, 16 }
  0x2f   : > { %v2221_v34 = vcombine.low %v525_v14, %v528_v24  ;;  %v500_v36 = vsel %vm2794_vm2, %v498_v20, %v499_v21  ;;  %v287_v38 = vrot.slane %v285_v22, 4  ;;  %v290_v42 = vrot.slane %v288_v23, 5  ;;  %v241_v20 = vld [vmem:[%s2746_s10 + $0x30] sm:$0xf] }
  0x30   : > { %v2217_v43 = vcombine.low %v497_v26, %v500_v36  ;;  %v296_v47 = vrot.slane %v294_v28, 5  ;;  %v300_v49 = vrot.slane %v298_v31, 4  ;;  %v304_v50 = vshll.u32 %v250_v8, 16 }
  0x31   : > { %1265 = vrot.lane.b32.xlu1 %v2221_v34, %s2640_s20  ;;  %v291_v51 = vor.u32 %v290_v42, %v287_v38  ;;  %v261_v52 = vshrl.u32 %v233_v33, 16  ;;  %v264_v53 = vshll.u32 %v233_v33, 16  ;;  %v270_v55 = vshll.u32 %v2804_v44, 16 }
  0x32   : > { %1257 = vrot.lane.b32.xlu0 %v2217_v43, %s2640_s20  ;;  %v301_v61 = vor.u32 %v300_v49, %v296_v47  ;;  %v306_v62 = vrot.slane %v304_v50, 5  ;;  %v274_v63 = vshrl.u32 %v2804_v44, 16  ;;  %v280_v0 = vshll.u32 %v2813_v48, 16 }
  0x33   : > { %v292_v2 = vrot.slane %v291_v51, 4  ;;  %v263_v4 = vrot.slane %v261_v52, 4  ;;  %v266_v5 = vrot.slane %v264_v53, 5  ;;  %v272_v6 = vrot.slane %v270_v55, 5  ;;  %v2881_v52 = vld [vmem:[%s2746_s10 + $0x44] sm:$0x1] }
  0x34   : > { %v302_v8 = vrot.slane %v301_v61, 4  ;;  %v276_v10 = vrot.slane %v274_v63, 4  ;;  %v282_v11 = vrot.slane %v280_v0, 5  ;;  %v381_v12 = vshrl.u32 %v243_v56, 16 }
  0x35   : > { %v297_v14 = vsel %vm2860_vm5, %v292_v2, %v296_v47  ;;  %v267_v15 = vor.u32 %v266_v5, %v263_v4  ;;  %v384_v16 = vshll.u32 %v243_v56, 16  ;;  %v390_v18 = vshll.u32 %v2821_v54, 16 }
  0x36   : > { %v307_v44 = vsel %vm2860_vm5, %v302_v8, %v306_v62  ;;  %v277_v48 = vor.u32 %v276_v10, %v272_v6  ;;  %v383_v21 = vrot.slane %v381_v12, 4  ;;  %v394_v22 = vshrl.u32 %v2821_v54, 16 }
  0x37   : > { %v2209_v23 = vcombine.low %v297_v14, %v307_v44  ;;  %v268_v24 = vrot.slane %v267_v15, 4  ;;  %v386_v26 = vrot.slane %v384_v16, 5  ;;  %v392_v28 = vrot.slane %v390_v18, 5  ;;  %v2908_v44 = vld [vmem:[%s2746_s10 + $0x50] sm:$0x1] }
  0x38   : > { %v278_v31 = vrot.slane %v277_v48, 4  ;;  %v396_v33 = vrot.slane %v394_v22, 4  ;;  %v400_v34 = vshll.u32 %v2824_v57, 16  ;;  %v357_v36 = vshrl.u32 %v241_v20, 16 }
  0x39   : > { %1217 = vrot.lane.b32.xlu1 %v2209_v23, %s2641_s21  ;;  %v273_v38 = vsel %vm2860_vm5, %v268_v24, %v272_v6  ;;  %v387_v42 = vor.u32 %v386_v26, %v383_v21  ;;  %v360_v43 = vshll.u32 %v241_v20, 16  ;;  %v366_v54 = vshll.u32 %v2783_v32, 16  ;;  %v2892_v6 = vld [vmem:[%s2746_s10 + $0x14] sm:$0x1] }
  0x3a   : > { %v283_v47 = vsel %vm2860_vm5, %v278_v31, %v282_v11  ;;  %v397_v49 = vor.u32 %v396_v33, %v392_v28  ;;  %v402_v50 = vrot.slane %v400_v34, 5  ;;  %v359_v51 = vrot.slane %v357_v36, 4  ;;  %v2923_v31 = vld [vmem:[%s2746_s10 + $0x20] sm:$0x1]  ;;  %v2146_v34 = vld [vmem:[%s2746_s10 + $0x3c] sm:$0xe] }
  0x3b   : > { %v2208_v57 = vcombine.low %v273_v38, %v283_v47  ;;  %v388_v53 = vrot.slane %v387_v42, 4  ;;  %v362_v55 = vrot.slane %v360_v43, 5  ;;  %v368_v56 = vrot.slane %v366_v54, 5  ;;  %v2142_v54 = vld [vmem:[%s2746_s10 + $0xc] sm:$0xe] }
  0x3c   : > { %v398_v61 = vrot.slane %v397_v49, 4  ;;  %v370_v62 = vshrl.u32 %v2783_v32, 16  ;;  %v376_v63 = vshll.u32 %v2789_v37, 16  ;;  %v679_v0 = vrot.slane %v677_v3, 5 }
  0x3d   : > { %1215 = vrot.lane.b32.xlu0 %v2208_v57, %s2641_s21  ;;  %v393_v2 = vsel %vm2860_vm5, %v388_v53, %v392_v28  ;;  %v363_v4 = vor.u32 %v362_v55, %v359_v51  ;;  %v687_v5 = vshll.u32 %v2881_v52, 16  ;;  %v583_v8 = vrot.slane %v581_v9, 5  ;;  %v2147_v53 = vld [vmem:[%s2746_s10 + $0x48] sm:$0xe] }
  0x3e   : > { %v403_v32 = vsel %vm2860_vm5, %v398_v61, %v402_v50  ;;  %v372_v37 = vrot.slane %v370_v62, 4  ;;  %v378_v10 = vrot.slane %v376_v63, 5  ;;  %v680_v3 = vsel %vm2860_vm5, %v2798_v40, %v679_v0 }
  0x3f   : > { %v2213_v11 = vcombine.low %v393_v2, %v403_v32  ;;  %v364_v12 = vrot.slane %v363_v4, 4  ;;  %v684_v14 = vor.u32 %v2763_v13, %v679_v0  ;;  %v689_v15 = vrot.slane %v687_v5, 5 }
  0x40   : > { %v373_v16 = vor.u32 %v372_v37, %v368_v56  ;;  %v584_v18 = vsel %vm2860_vm5, %v2806_v45, %v583_v8  ;;  %v588_v9 = vor.u32 %v2769_v19, %v583_v8  ;;  %v591_v20 = vshll.u32 %v2892_v6, 16 }
  0x41   : > { %1225 = vrot.lane.b32.xlu1 %v2213_v11, %s2641_s21  ;;  %v369_v40 = vsel %vm2860_vm5, %v364_v12, %v368_v56  ;;  %v685_v48 = vrot.slane %v684_v14, 4  ;;  %v699_v13 = vrot.slane %v698_v59, 4  ;;  %v701_v45 = vshll.u32 %v2767_v17, 16 }
  0x42   : > { %v374_v21 = vrot.slane %v373_v16, 4  ;;  %v589_v22 = vrot.slane %v588_v9, 4  ;;  %v593_v19 = vrot.slane %v591_v20, 5  ;;  %v707_v23 = vrot.slane %v705_v25, 4  ;;  %v2975_v20 = vld [vmem:[%s2746_s10 + $0x18] sm:$0xf] }
  0x43   : > { %v690_v24 = vsel %vm2860_vm5, %v685_v48, %v689_v15  ;;  %v703_v26 = vrot.slane %v701_v45, 5  ;;  %v711_v28 = vshll.u32 %v2908_v44, 16  ;;  %v603_v29 = vrot.slane %v602_v60, 4  ;;  %v2968_v15 = vld [vmem:[%s2746_s10 + $0x4c] sm:$0xf] }
  0x44   : > { %v379_v30 = vsel %vm2860_vm5, %v374_v21, %v378_v10  ;;  %v2236_v59 = vcombine.low %v680_v3, %v690_v24  ;;  %v594_v33 = vsel %vm2860_vm5, %v589_v22, %v593_v19  ;;  %v605_v25 = vshll.u32 %v2776_v27, 16  ;;  %v2981_v45 = vld [vmem:[%s2746_s10 + $0x1c] sm:$0xf] }
  0x45   : > { %v2212_v36 = vcombine.low %v369_v40, %v379_v30  ;;  %v2232_v38 = vcombine.low %v584_v18, %v594_v33  ;;  %v704_v42 = vsel %vm2860_vm5, %v699_v13, %v703_v26  ;;  %v708_v43 = vor.u32 %v707_v23, %v703_v26  ;;  %v2991_v23 = vld [vmem:[%s2746_s10 + $0x54] sm:$0xf] }
  0x46   : > { %1351 = vrot.lane.b32.xlu1 %v2236_v59, %s2642_s24  ;;  %v713_v41 = vrot.slane %v711_v28, 5  ;;  %v607_v46 = vrot.slane %v605_v25, 5  ;;  %v611_v60 = vrot.slane %v609_v35, 4  ;;  %v615_v47 = vshll.u32 %v2923_v31, 16 }
  0x47   : > { %1223 = vrot.lane.b32.xlu0 %v2212_v36, %s2641_s21  ;;  %v709_v49 = vrot.slane %v708_v43, 4  ;;  %v2154_v50 = vrot.slane %v2146_v34, 9  ;;  %v825_v51 = vrot.slane %v2750_v1, 5  ;;  %v828_v57 = vrot.slane %v2881_v52, 5  ;;  %v2143_v1 = vld [vmem:[%s2746_s10 + $0x18] sm:$0xe] }
  0x48   : > { %v608_v55 = vsel %vm2860_vm5, %v603_v29, %v607_v46  ;;  %v612_v56 = vor.u32 %v611_v60, %v607_v46  ;;  %v617_v61 = vrot.slane %v615_v47, 5  ;;  %v2150_v62 = vrot.slane %v2142_v54, 9  ;;  %v2997_v29 = vld [vmem:[%s2746_s10 + $0x58] sm:$0xf]  ;;  %v3003_v34 = vld [vmem:[%s2746_s10 + $0x24] sm:$0xf] }
  0x49   : > { %v714_v35 = vsel %vm2860_vm5, %v709_v49, %v713_v41  ;;  %v826_v63 = vsel %vm2794_vm2, %v2154_v50, %v825_v51  ;;  %v827_v0 = vrot.slane %v825_v51, 4  ;;  %v797_v2 = vrot.slane %v2757_v7, 5  ;;  %v2961_v7 = vld [vmem:[%s2746_s10 + $0x48] sm:$0xf]  ;;  %v3017_v49 = vld [vmem:[%s2746_s10 + $0x50] sm:$0x1] }
  0x4a   : > { %v2237_v52 = vcombine.low %v704_v42, %v714_v35  ;;  %v613_v4 = vrot.slane %v612_v56, 4  ;;  %v800_v5 = vrot.slane %v2892_v6, 5  ;;  %v2155_v8 = vrot.slane %v2147_v53, 9  ;;  %v3012_v54 = vld [vmem:[%s2746_s10 + $0x28] sm:$0xf] }
  0x4b   : > { %1343 = vrot.lane.b32.xlu0 %v2232_v38, %s2642_s24  ;;  %v829_v32 = vsel %vm2794_vm2, %v827_v0, %v828_v57  ;;  %v798_v37 = vsel %vm2794_vm2, %v2150_v62, %v797_v2  ;;  %v799_v10 = vrot.slane %v797_v2, 4  ;;  %v832_v3 = vrot.slane %v2767_v17, 5  ;;  %v3028_v35 = vld [vmem:[%s2746_s10 + $0x20] sm:$0x1] }
  0x4c   : > { %1353 = vrot.lane.b32.xlu1 %v2237_v52, %s2642_s24  ;;  %v618_v6 = vsel %vm2860_vm5, %v613_v4, %v617_v61  ;;  %v2244_v11 = vcombine.low %v826_v63, %v829_v32  ;;  %v835_v12 = vrot.slane %v2908_v44, 5  ;;  %v2151_v14 = vrot.slane %v2143_v1, 9 }
  0x4d   : > { %v2233_v16 = vcombine.low %v608_v55, %v618_v6  ;;  %v801_v18 = vsel %vm2794_vm2, %v799_v10, %v800_v5  ;;  %v833_v17 = vsel %vm2794_vm2, %v2155_v8, %v832_v3  ;;  %v834_v9 = vrot.slane %v832_v3, 4 }
  0x4e   : > { %v2240_v40 = vcombine.low %v798_v37, %v801_v18  ;;  %v804_v48 = vrot.slane %v2776_v27, 5  ;;  %v807_v44 = vrot.slane %v2923_v31, 5  ;;  %v976_v13 = vshrl.u32 %v2961_v7, 16 }
  0x4f   : > { %1345 = vrot.lane.b32.xlu0 %v2233_v16, %s2642_s24  ;;  %v836_v21 = vsel %vm2794_vm2, %v834_v9, %v835_v12  ;;  %v979_v22 = vshll.u32 %v2961_v7, 16  ;;  %v989_v19 = vshrl.u32 %v2968_v15, 16  ;;  %v2252_v27 = vcombine.low %v2961_v7, %v2968_v15 }
  0x50   : > { %1391 = vrot.lane.b32.xlu1 %v2244_v11, %s2643_s27  ;;  %v2245_v24 = vcombine.low %v833_v17, %v836_v21  ;;  %v805_v26 = vsel %vm2794_vm2, %v2151_v14, %v804_v48  ;;  %v806_v28 = vrot.slane %v804_v48, 4  ;;  %v978_v31 = vrot.slane %v976_v13, 4  ;;  %v3037_v11 = vld [vmem:[%s2746_s10 + $0x5c] sm:$0x1] }
  0x51   : > { %v981_v30 = vrot.slane %v979_v22, 5  ;;  %v880_v59 = vshrl.u32 %v2975_v20, 16  ;;  %v883_v33 = vshll.u32 %v2975_v20, 16  ;;  %v893_v25 = vshrl.u32 %v2981_v45, 16  ;;  %v3048_v22 = vld [vmem:[%s2746_s10 + $0x2c] sm:$0x1] }
  0x52   : > { %v808_v36 = vsel %vm2794_vm2, %v806_v28, %v807_v44  ;;  %v2248_v38 = vcombine.low %v2975_v20, %v2981_v45  ;;  %v1000_v42 = vshrl.u32 %v2991_v23, 16  ;;  %v1003_v43 = vshll.u32 %v2991_v23, 16 }
  0x53   : > { %1383 = vrot.lane.b32.xlu0 %v2240_v40, %s2643_s27  ;;  %v2241_v41 = vcombine.low %v805_v26, %v808_v36  ;;  %v882_v46 = vrot.slane %v880_v59, 4  ;;  %v885_v60 = vrot.slane %v883_v33, 5  ;;  %v1013_v47 = vshrl.u32 %v2997_v29, 16 }
  0x54   : > { %1393 = vrot.lane.b32.xlu1 %v2245_v24, %s2643_s27  ;;  %v1002_v50 = vrot.slane %v1000_v42, 4  ;;  %v1005_v51 = vrot.slane %v1003_v43, 5  ;;  %v2253_v57 = vcombine.low %v2991_v23, %v2997_v29  ;;  %v904_v53 = vshrl.u32 %v3003_v34, 16  ;;  %v2526_v23 = vld [vmem:[%s3666_s1] sm:$0xff]  }
  0x55   : > { %v907_v55 = vshll.u32 %v3003_v34, 16  ;;  %v917_v56 = vshrl.u32 %v3012_v54, 16  ;;  %v2249_v61 = vcombine.low %v3003_v34, %v3012_v54  ;;  %v982_v62 = vor.u32 %v981_v30, %v978_v31  ;;  %v2188_v30 = vld [vmem:[%s2746_s10 + $0x48] sm:$0xe]  ;;  %2387 = vmatprep.subr.bf16.mxu0 %v2526_v23  ;;  %2413 = vmatprep.subr.bf16.mxu1 %v2526_v23 }
  0x56   : > { %v906_v63 = vrot.slane %v904_v53, 4  ;;  %v985_v0 = vshll.u32 %v2968_v15, 16  ;;  %v991_v2 = vrot.slane %v989_v19, 4  ;;  %v995_v1 = vshll.u32 %v3017_v49, 16  ;;  %2388 = vmatpush3.bf16.msra.mxu0 %v2526_v23  ;;  %2418 = vmatpush3.bf16.msra.mxu1 %v2526_v23 }
  0x57   : > { %1385 = vrot.lane.b32.xlu0 %v2241_v41, %s2643_s27  ;;  %v909_v52 = vrot.slane %v907_v55, 5  ;;  %v983_v4 = vrot.slane %v982_v62, 4  ;;  %v886_v5 = vor.u32 %v885_v60, %v882_v46  ;;  %v889_v8 = vshll.u32 %v2981_v45, 16  ;;  %v2184_v41 = vld [vmem:[%s2746_s10 + $0x18] sm:$0xe]  ;;  %v2527_v46 = vld [vmem:[%s3666_s1 + $0x8] sm:$0xff]  }
  0x58   : > { %1439 = vrot.lane.b32.xlu1 %v2252_v27, %s2644_s28  ;;  %v987_v32 = vrot.slane %v985_v0, 5  ;;  %v997_v37 = vrot.slane %v995_v1, 5  ;;  %v895_v10 = vrot.slane %v893_v25, 4  ;;  %v899_v3 = vshll.u32 %v3028_v35, 16  ;;  %2389 = vmatprep.subr.bf16.mxu0 %v2527_v46  ;;  %v3077_v1 = vld [vmem:[%s2746_s10 + $0x4c] sm:$0xf] }
  0x59   : > { %v887_v7 = vrot.slane %v886_v5, 4  ;;  %v891_v6 = vrot.slane %v889_v8, 5  ;;  %v1006_v12 = vor.u32 %v1005_v51, %v1002_v50  ;;  %v1009_v14 = vshll.u32 %v2997_v29, 16  ;;  %2414 = vmatprep.subr.bf16.mxu1 %v2527_v46 }
  0x5a   : > { %v988_v16 = vsel %vm2860_vm5, %v983_v4, %v987_v32  ;;  %v992_v18 = vor.u32 %v991_v2, %v987_v32  ;;  %v901_v17 = vrot.slane %v899_v3, 5  ;;  %v1015_v9 = vrot.slane %v1013_v47, 4  ;;  %2390 = vmatpush3.bf16.msra.mxu0 %v2527_v46  ;;  %v3088_v32 = vld [vmem:[%s2746_s10 + $0x50] sm:$0x1]  ;;  %2419 = vmatpush3.bf16.msra.mxu1 %v2527_v46 }
  0x5b   : > { %1431 = vrot.lane.b32.xlu0 %v2248_v38, %s2644_s28  ;;  %v892_v20 = vsel %vm2860_vm5, %v887_v7, %v891_v6  ;;  %v896_v40 = vor.u32 %v895_v10, %v891_v6  ;;  %v1007_v48 = vrot.slane %v1006_v12, 4  ;;  %v1011_v44 = vrot.slane %v1009_v14, 5  ;;  %v237_v10 = vld [vmem:[%s2746_s10 + $0x18] sm:$0xf]  ;;  %v3096_v12 = vld [vmem:[%s2746_s10 + $0x1c] sm:$0xf] }
  0x5c   : > { %1441 = vrot.lane.b32.xlu1 %v2253_v57, %s2644_s28  ;;  %v993_v13 = vrot.slane %v992_v18, 4  ;;  %v1019_v21 = vshll.u32 %v3037_v11, 16  ;;  %v910_v19 = vor.u32 %v909_v52, %v906_v63  ;;  %v913_v27 = vshll.u32 %v3012_v54, 16  ;;  %v245_v57 = vld [vmem:[%s2746_s10 + $0x48] sm:$0xf] }
  0x5d   : > { %v897_v24 = vrot.slane %v896_v40, 4  ;;  %v1012_v26 = vsel %vm2860_vm5, %v1007_v48, %v1011_v44  ;;  %v1016_v28 = vor.u32 %v1015_v9, %v1011_v44  ;;  %v919_v31 = vrot.slane %v917_v56, 4  ;;  %v3102_v9 = vld [vmem:[%s2746_s10 + $0x20] sm:$0x1] }
  0x5e   : > { %v998_v59 = vsel %vm2860_vm5, %v993_v13, %v997_v37  ;;  %v1021_v33 = vrot.slane %v1019_v21, 5  ;;  %v911_v25 = vrot.slane %v910_v19, 4  ;;  %v915_v34 = vrot.slane %v913_v27, 5  ;;  %v2528_v13 = vld [vmem:[%s3666_s1 + $0x10] sm:$0xff]  }
  0x5f   : > { %1433 = vrot.lane.b32.xlu0 %v2249_v61, %s2644_s28  ;;  %v2260_v36 = vcombine.low %v988_v16, %v998_v59  ;;  %v902_v38 = vsel %vm2860_vm5, %v897_v24, %v901_v17  ;;  %v1017_v42 = vrot.slane %v1016_v28, 4  ;;  %v923_v43 = vshll.u32 %v3048_v22, 16  ;;  %v2189_v24 = vld [vmem:[%s2746_s10 + $0x54] sm:$0xe]  ;;  %2391 = vmatprep.subr.bf16.mxu0 %v2528_v13 }
  0x60   : > { %v2256_v60 = vcombine.low %v892_v20, %v902_v38  ;;  %v916_v47 = vsel %vm2860_vm5, %v911_v25, %v915_v34  ;;  %v920_v50 = vor.u32 %v919_v31, %v915_v34  ;;  %v2196_v51 = vrot.slane %v2188_v30, 9  ;;  %2415 = vmatprep.subr.bf16.mxu1 %v2528_v13  ;;  %2392 = vmatpush3.bf16.msra.mxu0 %v2528_v13 }
  0x61   : > { %1479 = vrot.lane.b32.xlu1 %v2260_v36, %s2645_s7  ;;  %v1022_v53 = vsel %vm2860_vm5, %v1017_v42, %v1021_v33  ;;  %v925_v55 = vrot.slane %v923_v43, 5  ;;  %v1133_v56 = vrot.slane %v2968_v15, 5  ;;  %v1136_v61 = vrot.slane %v3017_v49, 5  ;;  %v2185_v36 = vld [vmem:[%s2746_s10 + $0x24] sm:$0xe]  ;;  %2420 = vmatpush3.bf16.msra.mxu1 %v2528_v13 }
  0x62   : > { %v2261_v62 = vcombine.low %v1012_v26, %v1022_v53  ;;  %v921_v63 = vrot.slane %v920_v50, 4  ;;  %v2192_v0 = vrot.slane %v2184_v41, 9  ;;  %v1105_v2 = vrot.slane %v2981_v45, 5  ;;  %v458_v13 = vld [vmem:[%s2746_s10 + $0x48] sm:$0xe] }
  0x63   : > { %1471 = vrot.lane.b32.xlu0 %v2256_v60, %s2645_s7  ;;  %v1134_v52 = vsel %vm2794_vm2, %v2196_v51, %v1133_v56  ;;  %v1135_v4 = vrot.slane %v1133_v56, 4  ;;  %v1108_v15 = vrot.slane %v3028_v35, 5  ;;  %v405_v49 = vshrl.u32 %v245_v57, 16  ;;  %v3121_v51 = vld [vmem:[%s2746_s10 + $0x54] sm:$0xf] }
  0x64   : > { %v926_v5 = vsel %vm2860_vm5, %v921_v63, %v925_v55  ;;  %v1106_v45 = vsel %vm2794_vm2, %v2192_v0, %v1105_v2  ;;  %v1107_v8 = vrot.slane %v1105_v2, 4  ;;  %v408_v37 = vshll.u32 %v245_v57, 16  ;;  %v2529_v57 = vld [vmem:[%s3666_s1 + $0x18] sm:$0xff]  }
  0x65   : > { %1481 = vrot.lane.b32.xlu1 %v2261_v62, %s2645_s7  ;;  %v2257_v3 = vcombine.low %v916_v47, %v926_v5  ;;  %v1137_v35 = vsel %vm2794_vm2, %v1135_v4, %v1136_v61  ;;  %v407_v7 = vrot.slane %v405_v49, 4  ;;  %v414_v6 = vshll.u32 %v3077_v1, 16  ;;  %v3133_v0 = vld [vmem:[%s2746_s10 + $0x58] sm:$0xf]  ;;  %2393 = vmatprep.subr.bf16.mxu0 %v2529_v57 }
  0x66   : > { %v2268_v14 = vcombine.low %v1134_v52, %v1137_v35  ;;  %v1109_v16 = vsel %vm2794_vm2, %v1107_v8, %v1108_v15  ;;  %v410_v18 = vrot.slane %v408_v37, 5  ;;  %v418_v17 = vshrl.u32 %v3077_v1, 16  ;;  %2416 = vmatprep.subr.bf16.mxu1 %v2529_v57  ;;  %v3138_v15 = vld [vmem:[%s2746_s10 + $0x5c] sm:$0x1]  ;;  %2394 = vmatpush3.bf16.msra.mxu0 %v2529_v57  ;;  %v3146_v8 = vld [vmem:[%s2746_s10 + $0x24] sm:$0xf] }
  0x67   : > { %1473 = vrot.lane.b32.xlu0 %v2257_v3, %s2645_s7  ;;  %v2264_v20 = vcombine.low %v1106_v45, %v1109_v16  ;;  %v416_v40 = vrot.slane %v414_v6, 5  ;;  %v424_v48 = vshll.u32 %v3088_v32, 16  ;;  %v309_v44 = vshrl.u32 %v237_v10, 16  ;;  %2421 = vmatpush3.bf16.msra.mxu1 %v2529_v57 }
  0x68   : > { %v411_v21 = vor.u32 %v410_v18, %v407_v7  ;;  %v420_v19 = vrot.slane %v418_v17, 4  ;;  %v312_v27 = vshll.u32 %v237_v10, 16  ;;  %v318_v23 = vshll.u32 %v3096_v12, 16  ;;  %v3154_v7 = vld [vmem:[%s2746_s10 + $0x28] sm:$0xf] }
  0x69   : > { %1519 = vrot.lane.b32.xlu1 %v2268_v14, %s2646_s29  ;;  %v426_v26 = vrot.slane %v424_v48, 5  ;;  %v311_v28 = vrot.slane %v309_v44, 4  ;;  %v322_v31 = vshrl.u32 %v3096_v12, 16  ;;  %v328_v30 = vshll.u32 %v3102_v9, 16  ;;  %v3161_v17 = vld [vmem:[%s2746_s10 + $0x2c] sm:$0x1] }
  0x6a   : > { %v412_v59 = vrot.slane %v411_v21, 4  ;;  %v421_v33 = vor.u32 %v420_v19, %v416_v40  ;;  %v314_v25 = vrot.slane %v312_v27, 5  ;;  %v320_v34 = vrot.slane %v318_v23, 5 }
  0x6b   : > { %1511 = vrot.lane.b32.xlu0 %v2264_v20, %s2646_s29  ;;  %v324_v38 = vrot.slane %v322_v31, 4  ;;  %v330_v42 = vrot.slane %v328_v30, 5  ;;  %v2197_v43 = vrot.slane %v2189_v24, 9  ;;  %v1140_v41 = vrot.slane %v2997_v29, 5  ;;  %v454_v30 = vld [vmem:[%s2746_s10 + $0x18] sm:$0xe] }
  0x6c   : > { %v417_v46 = vsel %vm2860_vm5, %v412_v59, %v416_v40  ;;  %v422_v60 = vrot.slane %v421_v33, 4  ;;  %v315_v47 = vor.u32 %v314_v25, %v311_v28  ;;  %v1143_v50 = vrot.slane %v3037_v11, 5 }
  0x6d   : > { %v325_v53 = vor.u32 %v324_v38, %v320_v34  ;;  %v1141_v29 = vsel %vm2794_vm2, %v2197_v43, %v1140_v41  ;;  %v1142_v55 = vrot.slane %v1140_v41, 4  ;;  %v2193_v56 = vrot.slane %v2185_v36, 9 }
  0x6e   : > { %v427_v61 = vsel %vm2860_vm5, %v422_v60, %v426_v26  ;;  %v316_v62 = vrot.slane %v315_v47, 4  ;;  %v1112_v63 = vrot.slane %v3012_v54, 5  ;;  %v1115_v11 = vrot.slane %v3048_v22, 5 }
  0x6f   : > { %v2214_v2 = vcombine.low %v417_v46, %v427_v61  ;;  %v326_v52 = vrot.slane %v325_v53, 4  ;;  %v1144_v4 = vsel %vm2794_vm2, %v1142_v55, %v1143_v50  ;;  %v429_v49 = vshrl.u32 %v3121_v51, 16  ;;  %v459_v50 = vld [vmem:[%s2746_s10 + $0x54] sm:$0xe] }
  0x70   : > { %v321_v54 = vsel %vm2860_vm5, %v316_v62, %v320_v34  ;;  %v2269_v22 = vcombine.low %v1141_v29, %v1144_v4  ;;  %v1113_v5 = vsel %vm2794_vm2, %v2193_v56, %v1112_v63  ;;  %v1114_v45 = vrot.slane %v1112_v63, 4 }
  0x71   : > { %1227 = vrot.lane.b32.xlu1 %v2214_v2, %s2641_s21  ;;  %v331_v37 = vsel %vm2860_vm5, %v326_v52, %v330_v42  ;;  %v431_v10 = vrot.slane %v429_v49, 4  ;;  %v432_v3 = vshll.u32 %v3121_v51, 16  ;;  %v438_v35 = vshll.u32 %v3133_v0, 16 }
  0x72   : > { %v2210_v6 = vcombine.low %v321_v54, %v331_v37  ;;  %v1116_v14 = vsel %vm2794_vm2, %v1114_v45, %v1115_v11  ;;  %v442_v16 = vshrl.u32 %v3133_v0, 16  ;;  %v448_v18 = vshll.u32 %v3138_v15, 16 }
  0x73   : > { %v2265_v20 = vcombine.low %v1113_v5, %v1116_v14  ;;  %v434_v40 = vrot.slane %v432_v3, 5  ;;  %v440_v48 = vrot.slane %v438_v35, 5  ;;  %v333_v44 = vshrl.u32 %v3146_v8, 16 }
  0x74   : > { %1219 = vrot.lane.b32.xlu0 %v2210_v6, %s2641_s21  ;;  %v444_v21 = vrot.slane %v442_v16, 4  ;;  %v450_v19 = vrot.slane %v448_v18, 5  ;;  %v336_v27 = vshll.u32 %v3146_v8, 16  ;;  %v342_v23 = vshll.u32 %v3154_v7, 16  ;;  %v3207_v16 = vld [vmem:[%s2746_s10 + $0x24] sm:$0xf] }
  0x75   : > { %1521 = vrot.lane.b32.xlu1 %v2269_v22, %s2646_s29  ;;  %v435_v24 = vor.u32 %v434_v40, %v431_v10  ;;  %v335_v26 = vrot.slane %v333_v44, 4  ;;  %v346_v28 = vshrl.u32 %v3154_v7, 16  ;;  %v352_v31 = vshll.u32 %v3161_v17, 16  ;;  %v3200_v10 = vld [vmem:[%s2746_s10 + $0x58] sm:$0xf] }
  0x76   : > { %v445_v59 = vor.u32 %v444_v21, %v440_v48  ;;  %v338_v33 = vrot.slane %v336_v27, 5  ;;  %v344_v25 = vrot.slane %v342_v23, 5  ;;  %v2114_v34 = vrot.slane %v458_v13, 9  ;;  %v3218_v21 = vld [vmem:[%s2746_s10 + $0x28] sm:$0xf] }
  0x77   : > { %v436_v36 = vrot.slane %v435_v24, 4  ;;  %v348_v38 = vrot.slane %v346_v28, 4  ;;  %v354_v42 = vrot.slane %v352_v31, 5  ;;  %v531_v43 = vrot.slane %v3077_v1, 5  ;;  %v3228_v28 = vld [vmem:[%s2746_s10 + $0x64] sm:$0xf] }
  0x78   : > { %1513 = vrot.lane.b32.xlu0 %v2265_v20, %s2646_s29  ;;  %v446_v41 = vrot.slane %v445_v59, 4  ;;  %v339_v46 = vor.u32 %v338_v33, %v335_v26  ;;  %v534_v60 = vrot.slane %v3088_v32, 5  ;;  %v2110_v47 = vrot.slane %v454_v30, 9  ;;  %v455_v32 = vld [vmem:[%s2746_s10 + $0x24] sm:$0xe] }
  0x79   : > { %v441_v57 = vsel %vm2860_vm5, %v436_v36, %v440_v48  ;;  %v349_v53 = vor.u32 %v348_v38, %v344_v25  ;;  %v532_v29 = vsel %vm2794_vm2, %v2114_v34, %v531_v43  ;;  %v533_v55 = vrot.slane %v531_v43, 4  ;;  %v2132_v26 = vld [vmem:[%s2746_s10 + $0x60] sm:$0xf]  ;;  %v3237_v34 = vld [vmem:[%s2746_s10 + $0x34] sm:$0xf] }
  0x7a   : > { %v451_v1 = vsel %vm2860_vm5, %v446_v41, %v450_v19  ;;  %v340_v56 = vrot.slane %v339_v46, 4  ;;  %v503_v61 = vrot.slane %v3096_v12, 5  ;;  %v506_v62 = vrot.slane %v3102_v9, 5  ;;  %v3192_v12 = vld [vmem:[%s2746_s10 + $0x54] sm:$0xf] }
  0x7b   : > { %v2215_v63 = vcombine.low %v441_v57, %v451_v1  ;;  %v350_v11 = vrot.slane %v349_v53, 4  ;;  %v535_v2 = vsel %vm2794_vm2, %v533_v55, %v534_v60  ;;  %v2115_v52 = vrot.slane %v459_v50, 9  ;;  %v3250_v55 = vld [vmem:[%s2746_s10 + $0x5c] sm:$0x1] }
  0x7c   : > { %v345_v4 = vsel %vm2860_vm5, %v340_v56, %v344_v25  ;;  %v2222_v49 = vcombine.low %v532_v29, %v535_v2  ;;  %v504_v54 = vsel %vm2794_vm2, %v2110_v47, %v503_v61  ;;  %v505_v22 = vrot.slane %v503_v61, 4  ;;  %v3234_v25 = vld [vmem:[%s2746_s10 + $0x30] sm:$0xf] }
  0x7d   : > { %1229 = vrot.lane.b32.xlu1 %v2215_v63, %s2641_s21  ;;  %v355_v9 = vsel %vm2860_vm5, %v350_v11, %v354_v42  ;;  %v538_v5 = vrot.slane %v3133_v0, 5  ;;  %v541_v45 = vrot.slane %v3138_v15, 5  ;;  %v2111_v37 = vrot.slane %v455_v32, 9  ;;  %v3255_v32 = vld [vmem:[%s2746_s10 + $0x2c] sm:$0x1] }
  0x7e   : > { %v2211_v3 = vcombine.low %v345_v4, %v355_v9  ;;  %v507_v35 = vsel %vm2794_vm2, %v505_v22, %v506_v62  ;;  %v510_v6 = vrot.slane %v3154_v7, 5  ;;  %v513_v14 = vrot.slane %v3161_v17, 5 }
  0x7f   : > { %v2218_v18 = vcombine.low %v504_v54, %v507_v35  ;;  %v539_v15 = vsel %vm2794_vm2, %v2115_v52, %v538_v5  ;;  %v540_v20 = vrot.slane %v538_v5, 4  ;;  %v716_v40 = vshrl.u32 %v3192_v12, 16 }
  0x80   : > { %1221 = vrot.lane.b32.xlu0 %v2211_v3, %s2641_s21  ;;  %v511_v48 = vsel %vm2794_vm2, %v2111_v37, %v510_v6  ;;  %v512_v44 = vrot.slane %v510_v6, 4  ;;  %v719_v17 = vshll.u32 %v3192_v12, 16  ;;  %v729_v13 = vshrl.u32 %v3200_v10, 16  ;;  %v3264_v6 = vld [vmem:[%s2746_s10 + $0x68] sm:$0x1] }
  0x81   : > { %1267 = vrot.lane.b32.xlu1 %v2222_v49, %s2640_s20  ;;  %v542_v19 = vsel %vm2794_vm2, %v540_v20, %v541_v45  ;;  %v718_v27 = vrot.slane %v716_v40, 4  ;;  %v2230_v23 = vcombine.low %v3192_v12, %v3200_v10  ;;  %v620_v24 = vshrl.u32 %v3207_v16, 16 }
  0x82   : > { %v2223_v31 = vcombine.low %v539_v15, %v542_v19  ;;  %v514_v30 = vsel %vm2794_vm2, %v512_v44, %v513_v14  ;;  %v721_v59 = vrot.slane %v719_v17, 5  ;;  %v623_v33 = vshll.u32 %v3207_v16, 16 }
  0x83   : > { %v2219_v36 = vcombine.low %v511_v48, %v514_v30  ;;  %v622_v38 = vrot.slane %v620_v24, 4  ;;  %v633_v42 = vshrl.u32 %v3218_v21, 16  ;;  %v2226_v43 = vcombine.low %v3207_v16, %v3218_v21 }
  0x84   : > { %1259 = vrot.lane.b32.xlu0 %v2218_v18, %s2640_s20  ;;  %v625_v41 = vrot.slane %v623_v33, 5  ;;  %v740_v46 = vshrl.u32 %v2132_v26, 16  ;;  %v743_v60 = vshll.u32 %v2132_v26, 16  ;;  %v753_v47 = vshrl.u32 %v3228_v28, 16  ;;  %v2148_v33 = vld [vmem:[%s2746_s10 + $0x54] sm:$0xe] }
  0x85   : > { %1269 = vrot.lane.b32.xlu1 %v2223_v31, %s2640_s20  ;;  %v2231_v50 = vcombine.low %v2132_v26, %v3228_v28  ;;  %v644_v57 = vshrl.u32 %v3234_v25, 16  ;;  %v647_v53 = vshll.u32 %v3234_v25, 16  ;;  %v657_v29 = vshrl.u32 %v3237_v34, 16 }
  0x86   : > { %v742_v1 = vrot.slane %v740_v46, 4  ;;  %v745_v56 = vrot.slane %v743_v60, 5  ;;  %v2227_v61 = vcombine.low %v3234_v25, %v3237_v34  ;;  %v722_v62 = vor.u32 %v721_v59, %v718_v27  ;;  %v3275_v27 = vld [vmem:[%s2746_s10 + $0x38] sm:$0x1] }
  0x87   : > { %v646_v63 = vrot.slane %v644_v57, 4  ;;  %v649_v11 = vrot.slane %v647_v53, 5  ;;  %v725_v2 = vshll.u32 %v3200_v10, 16  ;;  %v731_v52 = vrot.slane %v729_v13, 4 }
  0x88   : > { %1261 = vrot.lane.b32.xlu0 %v2219_v36, %s2640_s20  ;;  %v723_v4 = vrot.slane %v722_v62, 4  ;;  %v735_v49 = vshll.u32 %v3250_v55, 16  ;;  %v626_v54 = vor.u32 %v625_v41, %v622_v38  ;;  %v629_v22 = vshll.u32 %v3218_v21, 16 }
  0x89   : > { %1315 = vrot.lane.b32.xlu1 %v2230_v23, %s2639_s11  ;;  %v727_v12 = vrot.slane %v725_v2, 5  ;;  %v635_v9 = vrot.slane %v633_v42, 4  ;;  %v639_v5 = vshll.u32 %v3255_v32, 16  ;;  %v746_v45 = vor.u32 %v745_v56, %v742_v1  ;;  %v2149_v1 = vld [vmem:[%s2746_s10 + $0x60] sm:$0xe] }
  0x8a   : > { %v737_v37 = vrot.slane %v735_v49, 5  ;;  %v627_v3 = vrot.slane %v626_v54, 4  ;;  %v631_v35 = vrot.slane %v629_v22, 5  ;;  %v749_v14 = vshll.u32 %v3228_v28, 16  ;;  %v2145_v49 = vld [vmem:[%s2746_s10 + $0x30] sm:$0xe] }
  0x8b   : > { %v728_v16 = vsel %vm2860_vm5, %v723_v4, %v727_v12  ;;  %v732_v18 = vor.u32 %v731_v52, %v727_v12  ;;  %v641_v15 = vrot.slane %v639_v5, 5  ;;  %v747_v20 = vrot.slane %v746_v45, 4  ;;  %v3308_v45 = vld [vmem:[%s2746_s10 + $0x60] sm:$0xf] }
  0x8c   : > { %1307 = vrot.lane.b32.xlu0 %v2226_v43, %s2639_s11  ;;  %v632_v40 = vsel %vm2860_vm5, %v627_v3, %v631_v35  ;;  %v636_v48 = vor.u32 %v635_v9, %v631_v35  ;;  %v751_v44 = vrot.slane %v749_v14, 5  ;;  %v755_v17 = vrot.slane %v753_v47, 4  ;;  %v2144_v47 = vld [vmem:[%s2746_s10 + $0x24] sm:$0xe] }
  0x8d   : > { %1317 = vrot.lane.b32.xlu1 %v2231_v50, %s2639_s11  ;;  %v733_v13 = vrot.slane %v732_v18, 4  ;;  %v759_v19 = vshll.u32 %v3264_v6, 16  ;;  %v650_v23 = vor.u32 %v649_v11, %v646_v63  ;;  %v653_v24 = vshll.u32 %v3237_v34, 16 }
  0x8e   : > { %v637_v26 = vrot.slane %v636_v48, 4  ;;  %v752_v31 = vsel %vm2860_vm5, %v747_v20, %v751_v44  ;;  %v756_v30 = vor.u32 %v755_v17, %v751_v44  ;;  %v659_v59 = vrot.slane %v657_v29, 4 }
  0x8f   : > { %v738_v25 = vsel %vm2860_vm5, %v733_v13, %v737_v37  ;;  %v761_v36 = vrot.slane %v759_v19, 5  ;;  %v651_v38 = vrot.slane %v650_v23, 4  ;;  %v655_v42 = vrot.slane %v653_v24, 5  ;;  %v3331_v13 = vld [vmem:[%s2746_s10 + $0x34] sm:$0xf] }
  0x90   : > { %1309 = vrot.lane.b32.xlu0 %v2227_v61, %s2639_s11  ;;  %v2238_v43 = vcombine.low %v728_v16, %v738_v25  ;;  %v642_v41 = vsel %vm2860_vm5, %v637_v26, %v641_v15  ;;  %v757_v46 = vrot.slane %v756_v30, 4  ;;  %v663_v60 = vshll.u32 %v3275_v27, 16  ;;  %v3317_v16 = vld [vmem:[%s2746_s10 + $0x64] sm:$0xf] }
  0x91   : > { %v2234_v50 = vcombine.low %v632_v40, %v642_v41  ;;  %v656_v57 = vsel %vm2860_vm5, %v651_v38, %v655_v42  ;;  %v660_v53 = vor.u32 %v659_v59, %v655_v42  ;;  %v2156_v29 = vrot.slane %v2148_v33, 9  ;;  %v3324_v40 = vld [vmem:[%s2746_s10 + $0x30] sm:$0xf] }
  0x92   : > { %1355 = vrot.lane.b32.xlu1 %v2238_v43, %s2642_s24  ;;  %v762_v56 = vsel %vm2860_vm5, %v757_v46, %v761_v36  ;;  %v665_v61 = vrot.slane %v663_v60, 5  ;;  %v839_v62 = vrot.slane %v3200_v10, 5  ;;  %v842_v63 = vrot.slane %v3250_v55, 5  ;;  %v3346_v33 = vld [vmem:[%s2746_s10 + $0x70] sm:$0xf] }
  0x93   : > { %v2239_v11 = vcombine.low %v752_v31, %v762_v56  ;;  %v661_v2 = vrot.slane %v660_v53, 4  ;;  %v2152_v52 = vrot.slane %v2144_v47, 9  ;;  %v811_v4 = vrot.slane %v3218_v21, 5  ;;  %v3310_v37 = vpop.permute.xlu1 %1311  ;;  %v3340_v31 = vld [vmem:[%s2746_s10 + $0x6c] sm:$0xf] }
  0x94   : > { %1347 = vrot.lane.b32.xlu0 %v2234_v50, %s2642_s24  ;;  %v840_v54 = vsel %vm2794_vm2, %v2156_v29, %v839_v62  ;;  %v841_v22 = vrot.slane %v839_v62, 4  ;;  %v814_v12 = vrot.slane %v3255_v32, 5  ;;  %v2157_v9 = vrot.slane %v2149_v1, 9  ;;  %v3352_v43 = vld [vmem:[%s2746_s10 + $0x3c] sm:$0xf]  ;;  %v3354_v41 = vpop.permute.xlu0 %1303 }
  0x95   : > { %v666_v10 = vsel %vm2860_vm5, %v661_v2, %v665_v61  ;;  %v812_v55 = vsel %vm2794_vm2, %v2152_v52, %v811_v4  ;;  %v813_v5 = vrot.slane %v811_v4, 4  ;;  %v846_v21 = vrot.slane %v3228_v28, 5  ;;  %v3366_v53 = vld [vmem:[%s2746_s10 + $0x40] sm:$0xf]  ;;  %v3370_v62 = vld [vmem:[%s2746_s10 + $0x68] sm:$0x1] }
  0x96   : > { %1357 = vrot.lane.b32.xlu1 %v2239_v11, %s2642_s24  ;;  %v2235_v3 = vcombine.low %v656_v57, %v666_v10  ;;  %v843_v32 = vsel %vm2794_vm2, %v841_v22, %v842_v63  ;;  %v849_v35 = vrot.slane %v3264_v6, 5  ;;  %v2153_v14 = vrot.slane %v2145_v49, 9 }
  0x97   : > { %v2246_v18 = vcombine.low %v840_v54, %v843_v32  ;;  %v815_v28 = vsel %vm2794_vm2, %v813_v5, %v814_v12  ;;  %v847_v15 = vsel %vm2794_vm2, %v2157_v9, %v846_v21  ;;  %v848_v20 = vrot.slane %v846_v21, 4  ;;  %v3356_v46 = vpop.permute.xlu1 %1313  ;;  %v3381_v12 = vld [vmem:[%s2746_s10 + $0x38] sm:$0x1] }
  0x98   : > { %1349 = vrot.lane.b32.xlu0 %v2235_v3, %s2642_s24  ;;  %v2242_v48 = vcombine.low %v812_v55, %v815_v28  ;;  %v818_v6 = vrot.slane %v3237_v34, 5  ;;  %v821_v44 = vrot.slane %v3275_v27, 5  ;;  %v1024_v17 = vshrl.u32 %v3308_v45, 16  ;;  %s208_s24 = sand.u32 1, %s2613_s13  }
  0x99   : > { %v850_v19 = vsel %vm2794_vm2, %v848_v20, %v849_v35  ;;  %v1027_v23 = vshll.u32 %v3308_v45, 16  ;;  %v1037_v24 = vshrl.u32 %v3317_v16, 16  ;;  %v2254_v26 = vcombine.low %v3308_v45, %v3317_v16  ;;  %v3387_v35 = vpop.permute.xlu0 %1305  ;;  %s3611_s11 = scalar_lea.sflag [#allocation4], %s208_s24 }
  0x9a   : > { %1395 = vrot.lane.b32.xlu1 %v2246_v18, %s2643_s27  ;;  %v2247_v34 = vcombine.low %v847_v15, %v850_v19  ;;  %v819_v27 = vsel %vm2794_vm2, %v2153_v14, %v818_v6  ;;  %v820_v30 = vrot.slane %v818_v6, 4  ;;  %v1026_v59 = vrot.slane %v1024_v17, 4  ;;  %v3394_v6 = vld [vmem:[%s2746_s10 + $0x74] sm:$0x1] }
  0x9b   : > { %v1029_v25 = vrot.slane %v1027_v23, 5  ;;  %v928_v36 = vshrl.u32 %v3324_v40, 16  ;;  %v931_v38 = vshll.u32 %v3324_v40, 16  ;;  %v941_v42 = vshrl.u32 %v3331_v13, 16 }
  0x9c   : > { %1387 = vrot.lane.b32.xlu0 %v2242_v48, %s2643_s27  ;;  %v822_v60 = vsel %vm2794_vm2, %v820_v30, %v821_v44  ;;  %v2250_v47 = vcombine.low %v3324_v40, %v3331_v13  ;;  %v1048_v50 = vshrl.u32 %v3340_v31, 16  ;;  %v1051_v57 = vshll.u32 %v3340_v31, 16 }
  0x9d   : > { %v2243_v29 = vcombine.low %v819_v27, %v822_v60  ;;  %v930_v1 = vrot.slane %v928_v36, 4  ;;  %v933_v56 = vrot.slane %v931_v38, 5  ;;  %v1061_v61 = vshrl.u32 %v3346_v33, 16  ;;  %v3405_v36 = vld [vmem:[%s2746_s10 + $0x44] sm:$0x1] }
  0x9e   : > { %1397 = vrot.lane.b32.xlu1 %v2247_v34, %s2643_s27  ;;  %v1050_v63 = vrot.slane %v1048_v50, 4  ;;  %v1053_v11 = vrot.slane %v1051_v57, 5  ;;  %v2255_v2 = vcombine.low %v3340_v31, %v3346_v33  ;;  %v952_v52 = vshrl.u32 %v3352_v43, 16  ;;  %v2190_v57 = vld [vmem:[%s2746_s10 + $0x60] sm:$0xe] }
  0x9f   : > { %v955_v4 = vshll.u32 %v3352_v43, 16  ;;  %v965_v49 = vshrl.u32 %v3366_v53, 16  ;;  %v2251_v54 = vcombine.low %v3352_v43, %v3366_v53  ;;  %v1030_v22 = vor.u32 %v1029_v25, %v1026_v59  ;;  %v3389_v14 = vpop.permute.xlu1 %1263 }
  0xa0   : > { %1389 = vrot.lane.b32.xlu0 %v2243_v29, %s2643_s27  ;;  %v954_v9 = vrot.slane %v952_v52, 4  ;;  %v1033_v10 = vshll.u32 %v3317_v16, 16  ;;  %v1039_v55 = vrot.slane %v1037_v24, 4  ;;  %v1043_v5 = vshll.u32 %v3370_v62, 16  ;;  %v3411_v29 = vpop.permute.xlu0 %1255  ;;  %s2103_s27 = sshll.u32 %s208_s24, 6 }
  0xa1   : > { %v957_v21 = vrot.slane %v955_v4, 5  ;;  %v1031_v45 = vrot.slane %v1030_v22, 4  ;;  %v934_v3 = vor.u32 %v933_v56, %v930_v1  ;;  %v937_v32 = vshll.u32 %v3331_v13, 16  ;;  %v2186_v22 = vld [vmem:[%s2746_s10 + $0x30] sm:$0xe] }
  0xa2   : > { %1443 = vrot.lane.b32.xlu1 %v2254_v26, %s2644_s28  ;;  %v1035_v18 = vrot.slane %v1033_v10, 5  ;;  %v1045_v28 = vrot.slane %v1043_v5, 5  ;;  %v943_v15 = vrot.slane %v941_v42, 4  ;;  %v947_v20 = vshll.u32 %v3381_v12, 16  ;;  %v2191_v5 = vld [vmem:[%s2746_s10 + $0x6c] sm:$0xe] }
  0xa3   : > { %v935_v40 = vrot.slane %v934_v3, 4  ;;  %v939_v48 = vrot.slane %v937_v32, 5  ;;  %v1054_v44 = vor.u32 %v1053_v11, %v1050_v63  ;;  %v1057_v17 = vshll.u32 %v3346_v33, 16  ;;  %v3413_v1 = vpop.permute.xlu1 %1265 }
  0xa4   : > { %1435 = vrot.lane.b32.xlu0 %v2250_v47, %s2644_s28  ;;  %v1036_v19 = vsel %vm2860_vm5, %v1031_v45, %v1035_v18  ;;  %v1040_v23 = vor.u32 %v1039_v55, %v1035_v18  ;;  %v949_v24 = vrot.slane %v947_v20, 5  ;;  %v1063_v26 = vrot.slane %v1061_v61, 4 }
  0xa5   : > { %v940_v31 = vsel %vm2860_vm5, %v935_v40, %v939_v48  ;;  %v944_v34 = vor.u32 %v943_v15, %v939_v48  ;;  %v1055_v27 = vrot.slane %v1054_v44, 4  ;;  %v1059_v30 = vrot.slane %v1057_v17, 5  ;;  %v2187_v40 = vld [vmem:[%s2746_s10 + $0x3c] sm:$0xe] }
  0xa6   : > { %1445 = vrot.lane.b32.xlu1 %v2255_v2, %s2644_s28  ;;  %v1041_v59 = vrot.slane %v1040_v23, 4  ;;  %v1067_v25 = vshll.u32 %v3394_v6, 16  ;;  %v958_v38 = vor.u32 %v957_v21, %v954_v9  ;;  %v961_v42 = vshll.u32 %v3366_v53, 16  ;;  %v3436_v23 = vpop.permute.xlu0 %1257 }
  0xa7   : > { %v945_v43 = vrot.slane %v944_v34, 4  ;;  %v1060_v60 = vsel %vm2860_vm5, %v1055_v27, %v1059_v30  ;;  %v1064_v47 = vor.u32 %v1063_v26, %v1059_v30  ;;  %v967_v50 = vrot.slane %v965_v49, 4 }
  0xa8   : > { %1437 = vrot.lane.b32.xlu0 %v2251_v54, %s2644_s28  ;;  %v1046_v56 = vsel %vm2860_vm5, %v1041_v59, %v1045_v28  ;;  %v1069_v61 = vrot.slane %v1067_v25, 5  ;;  %v959_v63 = vrot.slane %v958_v38, 4  ;;  %v963_v11 = vrot.slane %v961_v42, 5  ;;  %s3589_s28 = scalar_lea.vmem [#allocation3], %s2103_s27 }
  0xa9   : > { %v2262_v2 = vcombine.low %v1036_v19, %v1046_v56  ;;  %v950_v52 = vsel %vm2860_vm5, %v945_v43, %v949_v24  ;;  %v1065_v4 = vrot.slane %v1064_v47, 4  ;;  %v971_v49 = vshll.u32 %v3405_v36, 16 }
  0xaa   : > { %v2258_v9 = vcombine.low %v940_v31, %v950_v52  ;;  %v964_v10 = vsel %vm2860_vm5, %v959_v63, %v963_v11  ;;  %v968_v54 = vor.u32 %v967_v50, %v963_v11  ;;  %v2198_v55 = vrot.slane %v2190_v57, 9 }
  0xab   : > { %1483 = vrot.lane.b32.xlu1 %v2262_v2, %s2645_s7  ;;  %v1070_v21 = vsel %vm2860_vm5, %v1065_v4, %v1069_v61  ;;  %v973_v45 = vrot.slane %v971_v49, 5  ;;  %v1147_v3 = vrot.slane %v3317_v16, 5  ;;  %v1150_v32 = vrot.slane %v3370_v62, 5  ;;  %v3438_v16 = vpop.permute.xlu1 %1217 }
  0xac   : > { %1475 = vrot.lane.b32.xlu0 %v2258_v9, %s2645_s7  ;;  %v2263_v18 = vcombine.low %v1060_v60, %v1070_v21  ;;  %v969_v28 = vrot.slane %v968_v54, 4  ;;  %v2194_v15 = vrot.slane %v2186_v22, 9  ;;  %v1119_v20 = vrot.slane %v3331_v13, 5  ;;  %v2531_v54 = vld [vmem:[%s2746_s10 + $0x34] sm:$0xf] }
  0xad   : > { %v1148_v48 = vsel %vm2794_vm2, %v2198_v55, %v1147_v3  ;;  %v1149_v44 = vrot.slane %v1147_v3, 4  ;;  %v1122_v17 = vrot.slane %v3381_v12, 5  ;;  %v2199_v19 = vrot.slane %v2191_v5, 9  ;;  %v2532_v55 = vld [vmem:[%s2746_s10 + $0x30] sm:$0xf] }
  0xae   : > { %v974_v62 = vsel %vm2860_vm5, %v969_v28, %v973_v45  ;;  %v1120_v24 = vsel %vm2794_vm2, %v2194_v15, %v1119_v20  ;;  %v1121_v26 = vrot.slane %v1119_v20, 4  ;;  %v1154_v13 = vrot.slane %v3346_v33, 5  ;;  %v2533_v3 = vld [vmem:[%s2746_s10 + $0x4] sm:$0xf] }
  0xaf   : > { %1485 = vrot.lane.b32.xlu1 %v2263_v18, %s2645_s7  ;;  %v2259_v31 = vcombine.low %v964_v10, %v974_v62  ;;  %v1151_v12 = vsel %vm2794_vm2, %v1149_v44, %v1150_v32  ;;  %v1157_v34 = vrot.slane %v3394_v6, 5  ;;  %v2195_v27 = vrot.slane %v2187_v40, 9  ;;  %v1216_v50 = vpop.permute.xlu0 %1215  ;;  %v2534_v32 = vld [vmem:[%s2746_s10] sm:$0xf] }
  0xb0   : > { %v2270_v30 = vcombine.low %v1148_v48, %v1151_v12  ;;  %v1123_v58 = vsel %vm2794_vm2, %v1121_v26, %v1122_v17  ;;  %v1155_v59 = vsel %vm2794_vm2, %v2199_v19, %v1154_v13  ;;  %v1156_v25 = vrot.slane %v1154_v13, 4  ;;  %v2536_v26 = vld [vmem:[%s2746_s10 + $0x3c] sm:$0xf] }
  0xb1   : > { %1477 = vrot.lane.b32.xlu0 %v2259_v31, %s2645_s7  ;;  %v2266_v33 = vcombine.low %v1120_v24, %v1123_v58  ;;  %v1126_v38 = vrot.slane %v3366_v53, 5  ;;  %v1129_v42 = vrot.slane %v3405_v36, 5  ;;  %v2530_v36 = vld [vmem:[%s3666_s1 + $0x20] ss:$0 sps:$4 sm:$0xff]   ;;  %v2204_v5 = vcombine.low %v2532_v55, %v2531_v54  ;;  %s2305_s7 = sshll.u32 %s2625_s16, 5  ;;  %s1979_s16 = sshll.u32 %s3589_s28, 4  ;;  %s3605_s16 = int_to_ptr.vmem [resolvable:$true] %s1979_s16 }
  0xb2   : > { %v1158_v43 = vsel %vm2794_vm2, %v1156_v25, %v1157_v34  ;;  %2423 = vmatprep.subr.msk.bf16.mxu0 %vm1764_vm6, %v2530_v36  ;;  %2424 = vmatprep.subr.msk.bf16.mxu1 %vm1764_vm6, %v2530_v36  ;;  %v1766_v11 = vsel %vm1764_vm6, %v2530_v36, 0  ;;  %v2200_v18 = vcombine.low %v2534_v32, %v2533_v3  ;;  %v2538_v25 = vld [vmem:[%s2746_s10 + $0xc] sm:$0xf]  ;;  %s1976_s8 = sadd.s32 %s2326_s6, %s2305_s7  ;;  %s2543_s20 = scalar_lea.vmem %s3605_s16, 1024 }
  0xb3   : > { %1523 = vrot.lane.b32.xlu1 %v2270_v30, %s2646_s29  ;;  %v2271_v6 = vcombine.low %v1155_v59, %v1158_v43  ;;  %v1127_v60 = vsel %vm2794_vm2, %v2195_v27, %v1126_v38  ;;  %v1128_v47 = vrot.slane %v1126_v38, 4  ;;  %v3461_v57 = vpop.permute.xlu1 %1225  ;;  %2396 = vmatpush3.bf16.msra.mxu0 %v1766_v11  ;;  %v2537_v59 = vld [vmem:[%s2746_s10 + $0x10] sm:$0xf]  ;;  %s2306_s15 = sshll.u32 %s1976_s8, 6  ;;  %p2544_p13 = scmp.ne.s32.totalorder %s3605_s16, %s2543_s20 }
  0xb4   : > { %2422 = vmatpush3.bf16.msra.mxu1 %v1766_v11  ;;  %v1530_v40 = vsel %vm1527_vm7, %v2200_v18, %v1216_v50  ;;  %s3602_s5 = scalar_lea.hbm %s3668_s3, %s2306_s15 }
  0xb5   : > { %1515 = vrot.lane.b32.xlu0 %v2266_v33, %s2646_s29  ;;  %v1130_v53 = vsel %vm2794_vm2, %v1128_v47, %v1129_v42  ;;  %v1554_v19 = vsel %vm1552_vm8, %v1530_v40, %v3411_v29  ;;  %v2201_v33 = vcombine.low %v2538_v25, %v2537_v59  ;;  %p2545_p0 = pnand %p2544_p13, %p2720_p3 }
  0xb6   : > { %v2267_v56 = vcombine.low %v1127_v60, %v1130_v53  ;;  %v1571_v31 = vsel %vm1569_vm9, %v1554_v19, %v3354_v41 }
  0xb7   : > { %1525 = vrot.lane.b32.xlu1 %v2271_v6, %s2646_s29  ;;  %v1533_v47 = vsel %vm1527_vm7, %v2201_v33, %v3438_v16  ;;  %p2546_p1 = pneg %p2545_p0 }
  0xb8   : > { %v1352_v61 = vpop.permute.xlu1 %1351  ;;  %v1556_v53 = vsel %vm1552_vm8, %v1533_v47, %v3436_v23 }
  0xb9   : > { %1517 = vrot.lane.b32.xlu0 %v2267_v56, %s2646_s29  ;;  %v1224_v63 = vpop.permute.xlu0 %1223  ;;  %v1573_v16 = vsel %vm1569_vm9, %v1556_v53, %v3387_v35 }
  0xba   : > { %v1542_v28 = vsel %vm1527_vm7, %v2204_v5, %v1224_v63 }
  0xbb   : > { %v1562_v20 = vsel %vm1552_vm8, %v1542_v28, %v3389_v14  ;;  %v2535_v14 = vld [vmem:[%s2746_s10 + $0x40] sm:$0xf] }
  0xbc   : > { %v1579_v44 = vsel %vm1569_vm9, %v1562_v20, %v3310_v37  ;;  %v2205_v13 = vcombine.low %v2536_v26, %v2535_v14 }
  0xbd   : > { %v1344_v39 = vpop.permute.xlu0 %1343  ;;  %v1596_v24 = vsel %vm1586_vm10, %v1579_v44, %v1352_v61 }
  0xbe   : > { %v1354_v2 = vpop.permute.xlu1 %1353  ;;  %v1588_v29 = vsel %vm1586_vm10, %v1571_v31, %v1344_v39  ;;  %v1545_v42 = vsel %vm1527_vm7, %v2205_v13, %v3461_v57 }
  0xbf   : > { %v1564_v50 = vsel %vm1552_vm8, %v1545_v42, %v3413_v1 }
  0xc0   : > { %v1581_v57 = vsel %vm1569_vm9, %v1564_v50, %v3356_v46 }
  0xc1   : > { %v3471_v52 = vpop.permute.xlu0 %1345  ;;  %v1598_v36 = vsel %vm1586_vm10, %v1581_v57, %v1354_v2 }
  0xc2   : > { %v1392_v4 = vpop.permute.xlu1 %1391  ;;  %v1590_v23 = vsel %vm1586_vm10, %v1573_v16, %v3471_v52 }
  0xc3   : > { %v1613_v37 = vsel %vm1603_vm11, %v1596_v24, %v1392_v4 }
  0xc5   : > { %v1384_v49 = vpop.permute.xlu0 %1383 }
  0xc6   : > { %v1394_v22 = vpop.permute.xlu1 %1393  ;;  %v1605_v27 = vsel %vm1603_vm11, %v1588_v29, %v1384_v49  ;;  %v2540_v29 = vld [vmem:[%s2746_s10 + $0x4c] sm:$0xf] }
  0xc7   : > { %v1615_v63 = vsel %vm1603_vm11, %v1598_v36, %v1394_v22 }
  0xc9   : > { %v3473_v9 = vpop.permute.xlu0 %1385 }
  0xca   : > { %v1440_v10 = vpop.permute.xlu1 %1439  ;;  %v1607_v2 = vsel %vm1603_vm11, %v1590_v23, %v3473_v9 }
  0xcb   : > { %v1630_v34 = vsel %vm1620_vm12, %v1613_v37, %v1440_v10 }
  0xcd   : > { %v1432_v21 = vpop.permute.xlu0 %1431 }
  0xce   : > { %v1442_v45 = vpop.permute.xlu1 %1441  ;;  %v1622_v38 = vsel %vm1620_vm12, %v1605_v27, %v1432_v21  ;;  %v2541_v27 = vld [vmem:[%s2746_s10 + $0x18] sm:$0xf] }
  0xcf   : > { %v1632_v11 = vsel %vm1620_vm12, %v1615_v63, %v1442_v45 }
  0xd1   : > { %v1434_v15 = vpop.permute.xlu0 %1433 }
  0xd2   : > { %v1624_v22 = vsel %vm1620_vm12, %v1607_v2, %v1434_v15 }
  0xd3   : > { %v1480_v48 = vpop.permute.xlu1 %1479 }
  0xd4   : > { %v1647_v30 = vsel %vm1637_vm13, %v1630_v34, %v1480_v48 }
  0xd5   : > { %v1472_v17 = vpop.permute.xlu0 %1471 }
  0xd6   : > { %v1639_v43 = vsel %vm1637_vm13, %v1622_v38, %v1472_v17  ;;  %v2207_v38 = vcombine.low %v3121_v51, %v3133_v0 }
  0xd7   : > { %v1482_v62 = vpop.permute.xlu1 %1481 }
  0xd8   : > { %v1649_v46 = vsel %vm1637_vm13, %v1632_v11, %v1482_v62 }
  0xd9   : > { %v1474_v12 = vpop.permute.xlu0 %1473 }
  0xda   : > { %v1641_v35 = vsel %vm1637_vm13, %v1624_v22, %v1474_v12  ;;  %v2539_v12 = vld [vmem:[%s2746_s10 + $0x48] sm:$0xf] }
  0xdb   : > { %v1520_v58 = vpop.permute.xlu1 %1519  ;;  %v2206_v34 = vcombine.low %v2539_v12, %v2540_v29 }
  0xdc   : > { %v1668_v41 = vsel %vm1654_vm14, %v1647_v30, %v1520_v58  ;;  %v2542_v30 = vld [vmem:[%s2746_s10 + $0x1c] sm:$0xf]  ;;  %s2647_s10 = smov [#allocation3]  }
  0xdd   : > { %1684 = vst.msk [vmem:[#allocation2 + $0x20] sm:$0xff] %vm1679_vm15, %v1668_v41  ;;  %v1512_v6 = vpop.permute.xlu0 %1511  ;;  %v2202_v58 = vcombine.low %v2541_v27, %v2542_v30  ;;  %s2547_s21 = sshll.u32 %s2647_s10, 4  ;;  %s2548_s21 = int_to_ptr.vmem [resolvable:$false] %s2547_s21 }
  0xde   : > { %v1656_v60 = vsel %vm1654_vm14, %v1639_v43, %v1512_v6  ;;  %v2203_v43 = vcombine.low %v3146_v8, %v3154_v7  ;;  %s2549_s27 = scalar_lea.vmem %s2548_s21, 2048  ;;  %p2550_p2 = scmp.lt.s32.totalorder %s3605_s16, %s2548_s21 }
  0xdf   : > { %1680 = vst.msk [vmem:[#allocation2] sm:$0xff] %vm1679_vm15, %v1656_v60  ;;  %p2551_p4 = scmp.lt.s32.totalorder %s2549_s27, %s2543_s20 }
  0xe1   : > { %p2552_p5 = por %p2551_p4, %p2550_p2 }
  0xe3   : > { %v1228_v56 = vpop.permute.xlu1 %1227  ;;  %p2553_p6 = pnand %p2552_p5, %p2546_p1 }
  0xe4   : > { %v1692_v61 = vld [vmem:[#allocation2 + $0x20] sm:$0xff]  ;;  %v1548_v33 = vsel %vm1527_vm7, %v2206_v34, %v1228_v56 }
  0xe5   : > { %2405 = vmatprep.mubr.msk.bf16.mxu1 %vm1679_vm15, %v1692_v61 }
  0xe6   : > { %v1220_v1 = vpop.permute.xlu0 %1219  ;;  %v1688_v39 = vld [vmem:[#allocation2] sm:$0xff] }
  0xe7   : > { %v1522_v4 = vpop.permute.xlu1 %1521  ;;  %2397 = vmatprep.mubr.msk.bf16.mxu0 %vm1679_vm15, %v1688_v39  ;;  %v1536_v42 = vsel %vm1527_vm7, %v2202_v58, %v1220_v1 }
  0xe8   : > { %v1671_v49 = vsel %vm1654_vm14, %v1649_v46, %v1522_v4 }
  0xe9   : > { %1685 = vst.msk [vmem:[#allocation2 + $0x28] sm:$0xff] %vm1679_vm15, %v1671_v49 }
  0xea   : > { %v1514_v10 = vpop.permute.xlu0 %1513 }
  0xeb   : > { %v1659_v54 = vsel %vm1654_vm14, %v1641_v35, %v1514_v10 }
  0xec   : > { %1681 = vst.msk [vmem:[#allocation2 + $0x8] sm:$0xff] %vm1679_vm15, %v1659_v54 }
  0xef   : > { %v1230_v52 = vpop.permute.xlu1 %1229 }
  0xf0   : > { %v1693_v55 = vld [vmem:[#allocation2 + $0x28] sm:$0xff]  ;;  %v1551_v53 = vsel %vm1527_vm7, %v2207_v38, %v1230_v52 }
  0xf1   : > { %2406 = vmatmul.mubr.msk.bf16.vlgmr.msra.gmra.mrb[0].mxu1 %vm1679_vm15, %v1693_v55 }
  0xf2   : > { %v1222_v5 = vpop.permute.xlu0 %1221 }
  0xf3   : > { %v1268_v21 = vpop.permute.xlu1 %1267  ;;  %v1689_v9 = vld [vmem:[#allocation2 + $0x8] sm:$0xff]  ;;  %v1539_v7 = vsel %vm1527_vm7, %v2203_v43, %v1222_v5 }
  0xf4   : > { %2398 = vmatmul.mubr.msk.bf16.vlgmr.msra.gmra.mrb[0].mxu0 %vm1679_vm15, %v1689_v9  ;;  %v1566_v41 = vsel %vm1552_vm8, %v1548_v33, %v1268_v21 }
  0xf6   : > { %v1260_v45 = vpop.permute.xlu0 %1259 }
  0xf7   : > { %v1270_v3 = vpop.permute.xlu1 %1269  ;;  %v1558_v47 = vsel %vm1552_vm8, %v1536_v42, %v1260_v45 }
  0xf8   : > { %v1568_v56 = vsel %vm1552_vm8, %v1551_v53, %v1270_v3 }
  0xfa   : > { %v1262_v32 = vpop.permute.xlu0 %1261 }
  0xfb   : > { %v1316_v18 = vpop.permute.xlu1 %1315  ;;  %v1560_v1 = vsel %vm1552_vm8, %v1539_v7, %v1262_v32 }
  0xfc   : > { %v1583_v6 = vsel %vm1569_vm9, %v1566_v41, %v1316_v18 }
  0xfe   : > { %v1308_v28 = vpop.permute.xlu0 %1307 }
  0xff   : > { %v1318_v15 = vpop.permute.xlu1 %1317  ;;  %v1575_v57 = vsel %vm1569_vm9, %v1558_v47, %v1308_v28 }
 0x100   : > { %v1585_v61 = vsel %vm1569_vm9, %v1568_v56, %v1318_v15 }
 0x102   : > { %v1310_v20 = vpop.permute.xlu0 %1309 }
 0x103   : > { %v1577_v4 = vsel %vm1569_vm9, %v1560_v1, %v1310_v20 }
 0x104   : > { %v1356_v40 = vpop.permute.xlu1 %1355 }
 0x105   : > { %v1600_v50 = vsel %vm1586_vm10, %v1583_v6, %v1356_v40  ;;  %v2272_v40 = vld [vmem:[%s3667_s2] ss:$0 sm:$0xff] }
 0x106   : > { %v1348_v48 = vpop.permute.xlu0 %1347 }
 0x107   : > { %v1592_v36 = vsel %vm1586_vm10, %v1575_v57, %v1348_v48 }
 0x108   : > { %v1358_v44 = vpop.permute.xlu1 %1357 }
 0x109   : > { %v1602_v39 = vsel %vm1586_vm10, %v1585_v61, %v1358_v44 }
 0x10a   : > { %v1350_v17 = vpop.permute.xlu0 %1349 }
 0x10b   : > { %v1594_v35 = vsel %vm1586_vm10, %v1577_v4, %v1350_v17 }
 0x10c   : > { %v1396_v19 = vpop.permute.xlu1 %1395 }
 0x10d   : > { %v1617_v51 = vsel %vm1603_vm11, %v1600_v50, %v1396_v19 }
 0x10e   : > { %v1388_v62 = vpop.permute.xlu0 %1387 }
 0x10f   : > { %v1609_v63 = vsel %vm1603_vm11, %v1592_v36, %v1388_v62 }
 0x110   : > { %v1398_v24 = vpop.permute.xlu1 %1397 }
 0x111   : > { %v1619_v2 = vsel %vm1603_vm11, %v1602_v39, %v1398_v24 }
 0x112   : > { %v1390_v14 = vpop.permute.xlu0 %1389 }
 0x113   : > { %v1611_v52 = vsel %vm1603_vm11, %v1594_v35, %v1390_v14 }
 0x114   : > { %v1444_v26 = vpop.permute.xlu1 %1443 }
 0x115   : > { %v1634_v8 = vsel %vm1620_vm12, %v1617_v51, %v1444_v26 }
 0x116   : > { %v1436_v13 = vpop.permute.xlu0 %1435 }
 0x117   : > { %v1626_v23 = vsel %vm1620_vm12, %v1609_v63, %v1436_v13 }
 0x118   : > { %v1446_v31 = vpop.permute.xlu1 %1445 }
 0x119   : > { %v1636_v10 = vsel %vm1620_vm12, %v1619_v2, %v1446_v31 }
 0x11a   : > { %v1438_v37 = vpop.permute.xlu0 %1437 }
 0x11b   : > { %v1628_v21 = vsel %vm1620_vm12, %v1611_v52, %v1438_v37 }
 0x11d   : > { %v1484_v59 = vpop.permute.xlu1 %1483 }
 0x11e   : > { %v1476_v25 = vpop.permute.xlu0 %1475  ;;  %v1651_v16 = vsel %vm1637_vm13, %v1634_v8, %v1484_v59 }
 0x11f   : > { %v1643_v49 = vsel %vm1637_vm13, %v1626_v23, %v1476_v25 }
 0x121   : > { %v1486_v60 = vpop.permute.xlu1 %1485 }
 0x122   : > { %v1653_v55 = vsel %vm1637_vm13, %v1636_v10, %v1486_v60 }
 0x123   : > { %v1478_v0 = vpop.permute.xlu0 %1477 }
 0x124   : > { %v1645_v45 = vsel %vm1637_vm13, %v1628_v21, %v1478_v0 }
 0x125   : > { %v1524_v11 = vpop.permute.xlu1 %1523 }
 0x126   : > { %v1674_v46 = vsel %vm1654_vm14, %v1651_v16, %v1524_v11 }
 0x127   : > { %1686 = vst.msk [vmem:[#allocation2 + $0x30] sm:$0xff] %vm1679_vm15, %v1674_v46  ;;  %v1516_v22 = vpop.permute.xlu0 %1515 }
 0x128   : > { %v1662_v54 = vsel %vm1654_vm14, %v1643_v49, %v1516_v22 }
 0x129   : > { %1682 = vst.msk [vmem:[#allocation2 + $0x10] sm:$0xff] %vm1679_vm15, %v1662_v54  ;;  %v1526_v5 = vpop.permute.xlu1 %1525 }
 0x12a   : > { %v1677_v9 = vsel %vm1654_vm14, %v1653_v55, %v1526_v5 }
 0x12b   : > { %1687 = vst.msk [vmem:[#allocation2 + $0x38] sm:$0xff] %vm1679_vm15, %v1677_v9  ;;  %v1518_v3 = vpop.permute.xlu0 %1517 }
 0x12c   : > { %v1665_v32 = vsel %vm1654_vm14, %v1645_v45, %v1518_v3 }
 0x12d   : > { %1683 = vst.msk [vmem:[#allocation2 + $0x18] sm:$0xff] %vm1679_vm15, %v1665_v32 }
 0x12e   : > { %v1694_v18 = vld [vmem:[#allocation2 + $0x30] sm:$0xff] }
 0x12f   : > { %2409 = vmatprep.mubr.msk.bf16.mxu1 %vm1679_vm15, %v1694_v18 }
 0x130   : > { %v1690_v28 = vld [vmem:[#allocation2 + $0x10] sm:$0xff] }
 0x131   : > { %2401 = vmatprep.mubr.msk.bf16.mxu0 %vm1679_vm15, %v1690_v28 }
 0x132   : > { %v1695_v15 = vld [vmem:[#allocation2 + $0x38] sm:$0xff] }
 0x133   : > { %2410 = vmatmul.mubr.msk.bf16.gmra.mrb[4].mxu1 %vm1679_vm15, %v1695_v15 }
 0x134   : > { %v1691_v20 = vld [vmem:[#allocation2 + $0x18] sm:$0xff] }
 0x135   : > { %2402 = vmatmul.mubr.msk.bf16.gmra.mrb[4].mxu0 %vm1679_vm15, %v1691_v20 }
 0x1c4   : > { %v2407_v48 = vpop.f32.mrb[0].mxu1 }
 0x1c5   : > { %v1843_v44 = vadd.f32 %v2407_v48, %v2272_v40  ;;  %v1834_v17 = vpop.f32.mrb[1].mxu1 }
 0x1c6   : > { %v1835_v19 = vadd.f32 %v2272_v40, %v1834_v17  ;;  %v2408_v62 = vpop.f32.mrb[2].mxu1 }
 0x1c7   : > { %v2399_v24 = vpop.f32.mrb[0].mxu0  ;;  %v1846_v14 = vadd.f32 %v2408_v62, %v2272_v40  ;;  %v1837_v26 = vpop.f32.mrb[3].mxu1  ;;  %v1875_v12 = vmax.f32 %v1843_v44, 0.0 }
 0x1c8   : > { %v1811_v13 = vadd.f32 %v2399_v24, %v2272_v40  ;;  %v1802_v31 = vpop.f32.mrb[1].mxu0  ;;  %v1838_v37 = vadd.f32 %v2272_v40, %v1837_v26  ;;  %v1873_v30 = vmax.f32 %v1835_v19, 0.0 }
 0x1c9   : > { %v1803_v29 = vadd.f32 %v2272_v40, %v1802_v31  ;;  %v2400_v34 = vpop.f32.mrb[2].mxu0  ;;  %v1876_v27 = vmax.f32 %v1846_v14, 0.0 }
 0x1ca   : > { %v1814_v58 = vadd.f32 %v2400_v34, %v2272_v40  ;;  %v1805_v59 = vpop.f32.mrb[3].mxu0  ;;  %v1874_v25 = vmax.f32 %v1838_v37, 0.0  ;;  %v1867_v41 = vmax.f32 %v1811_v13, 0.0 }
 0x1cb   : > { %v2355_v33 = vpack.c.bf16 %v1876_v27, %v1875_v12  ;;  %v1806_v38 = vadd.f32 %v2272_v40, %v1805_v59  ;;  %v1865_v6 = vmax.f32 %v1803_v29, 0.0 }
 0x1cc   : > { %v1868_v42 = vmax.f32 %v1814_v58, 0.0  ;;  %v2350_v43 = vpack.c.bf16 %v1874_v25, %v1873_v30 }
 0x1cd   : > { %2371 = vst [vmem:[%s3589_s28 + $0x28] sm:$0xff] %v2355_v33   ;;  %v1866_v60 = vmax.f32 %v1806_v38, 0.0 }
 0x1ce   : > { %v2335_v47 = vpack.c.bf16 %v1868_v42, %v1867_v41  ;;  %2370 = vst [vmem:[%s3589_s28 + $0x20] sm:$0xff] %v2350_v43  }
 0x1cf   : > { %v2330_v50 = vpack.c.bf16 %v1866_v60, %v1865_v6 }
 0x1d0   : > { %2367 = vst [vmem:[%s3589_s28 + $0x8] sm:$0xff] %v2335_v47  }
 0x1d1   : > { %2331 = vst [vmem:[%s3589_s28] sm:$0xff] %v2330_v50  }
 0x206   : > { %v2411_v53 = vpop.f32.mrb[4].mxu1 }
 0x207   : > { %v1859_v57 = vadd.f32 %v2411_v53, %v2272_v40  ;;  %v1850_v51 = vpop.f32.mrb[5].mxu1 }
 0x208   : > { %v2403_v0 = vpop.f32.mrb[4].mxu0  ;;  %v1851_v56 = vadd.f32 %v2272_v40, %v1850_v51  ;;  %v2412_v36 = vpop.f32.mrb[6].mxu1 }
 0x209   : > { %v1827_v8 = vadd.f32 %v2403_v0, %v2272_v40  ;;  %v1818_v7 = vpop.f32.mrb[5].mxu0  ;;  %v1862_v61 = vadd.f32 %v2412_v36, %v2272_v40  ;;  %v1853_v63 = vpop.f32.mrb[7].mxu1  ;;  %v1879_v39 = vmax.f32 %v1859_v57, 0.0 }
 0x20a   : > { %v1819_v16 = vadd.f32 %v2272_v40, %v1818_v7  ;;  %v2404_v11 = vpop.f32.mrb[6].mxu0  ;;  %v1854_v1 = vadd.f32 %v2272_v40, %v1853_v63  ;;  %v1877_v2 = vmax.f32 %v1851_v56, 0.0 }
 0x20b   : > { %v1830_v23 = vadd.f32 %v2404_v11, %v2272_v40  ;;  %v1880_v46 = vmax.f32 %v1862_v61, 0.0  ;;  %v1821_v4 = vpop.f32.mrb[7].mxu0  ;;  %v1871_v35 = vmax.f32 %v1827_v8, 0.0 }
 0x20c   : > { %v1822_v49 = vadd.f32 %v2272_v40, %v1821_v4  ;;  %v1878_v22 = vmax.f32 %v1854_v1, 0.0  ;;  %v1869_v52 = vmax.f32 %v1819_v16, 0.0 }
 0x20d   : > { %v1872_v10 = vmax.f32 %v1830_v23, 0.0  ;;  %v2365_v54 = vpack.c.bf16 %v1880_v46, %v1879_v39 }
 0x20e   : > { %v1870_v55 = vmax.f32 %v1822_v49, 0.0  ;;  %v2360_v5 = vpack.c.bf16 %v1878_v22, %v1877_v2 }
 0x20f   : > { %v2345_v21 = vpack.c.bf16 %v1872_v10, %v1871_v35  ;;  %2373 = vst [vmem:[%s3589_s28 + $0x38] sm:$0xff] %v2365_v54  }
 0x210   : > { %v2340_v9 = vpack.c.bf16 %v1870_v55, %v1869_v52  ;;  %2372 = vst [vmem:[%s3589_s28 + $0x30] sm:$0xff] %v2360_v5  }
 0x211   : > { %2369 = vst [vmem:[%s3589_s28 + $0x18] sm:$0xff] %v2345_v21  }
 0x212   : > { %2368 = vst [vmem:[%s3589_s28 + $0x10] sm:$0xff] %v2340_v9  }
 0x213   : > { %2556 = shalt.err (!%p2553_p6)
}
 0x214   : > { %s2557_s24 = scalar_lea.hbm %s3602_s5, 1024  ;;  %s2561_s7 = scalar_lea.hbm %s3668_s3, 4096 }
 0x215   : > { %p2558_p7 = scmp.ne.s32.totalorder %s3602_s5, %s2557_s24  ;;  %p2562_p11 = scmp.lt.u32.totalorder %s3602_s5, %s3668_s3 }
 0x216   : > { %p2563_p12 = scmp.lt.u32.totalorder %s2561_s7, %s2557_s24  ;;  %p2565_p0 = scmp.lt.u32.totalorder %s2557_s24, %s3602_s5 }
 0x217   : > { %p2559_p9 = pnand %p2558_p7, %p2720_p3 }
 0x218   : > { %p2564_p13 = por %p2563_p12, %p2562_p11 }
 0x219   : > { %p2560_p10 = pneg %p2559_p9 }
 0x21a   : > { %p2566_p1 = por %p2565_p0, %p2564_p13 }
 0x21c   : > { %p2567_p2 = pnand %p2566_p1, %p2560_p10 }
 0x21e   : > { %2570 = shalt.err (!%p2567_p2)
}
 0x21f   : > { %s2648_s9 = smov 4  }
 0x220   : > { %2426 = dma.vmem_to_hbm [thread:$0]  (%p2720_p3), %s3605_s16, 1024, %s3602_s5, %s3611_s11, %s2646_s29, %s2646_s29, %s2648_s9  }
 0x221 PF: > { %p2432_p4 = scmp.ge.s32.totalorder %s2637_s19, 2  ;;  %s1994_s4 = sand.u32 1, %s2609_s12  }
 0x222   : > { %s1995_s20 = scalar_lea.sflag [#allocation4], %s1994_s4 }
 0x223   : > { %p2429_p5 = pnand %p2432_p4, %p2729_p8 }
 0x225   : > { %2604 = dma.done.wait (!%p2429_p5), %s1995_s20, 1024  }
 0x226   : > { %2606 = vsyncadd (!%p2429_p5), %s1995_s20, 4294966272  ;;  %s16_s19 = sadd.s32 1, %s2637_s19   ;;  %s3675_s12 = smov %s2613_s13 }
 0x227   : > { %p13_p6 = scmp.ge.s32.totalorder %s16_s19, 6   ;;  %s3676_s13 = smov %s2617_s14 }
 0x228   : > { %s3677_s14 = smov %s2738_s30  ;;  %s3678_s15 = smov %s2629_s17 }
 0x229   : > { %s3679_s16 = smov %s2633_s18  ;;  %s3680_s17 = smov %s3683_s22 }
 0x22a   : > { %s3681_s18 = smov %s3687_s23  ;;  %15 = sbr.rel (!%p13_p6) target bundleno = 5 (0x5), region = 80 }
 0x231   :  { %2000 = vsyncpa [#allocation4], 1 }
 0x232   :  { %2002 = vsyncpa [#allocation4 + $0x1], 1 }

</bundles_post_ra>
